<compile_context>
chip_gen: v6e
topology: v6e:2x2x1
jax: 0.10.0
libtpu: 0.0.40
codegen_flags: <defaults>
</compile_context>

<pallas_src>
import functools

import numpy as np
import jax
import jax.numpy as jnp
from jax.experimental import pallas as pl
from jax.experimental.pallas import tpu as pltpu


def _round_up(x, m):
    return (x + m - 1) // m * m


def _gru_recurrence_kernel(chunk, Hp, T, compute_dtype,
                           gi_ref, whh_ref, bhn_ref, h_ref):
    """One grid step = up to `chunk` timesteps of the GRU recurrence for one
    batch block.

    gi_ref : (chunk, bb, 3*Hp)  precomputed W_ih x_t + b_ih (+ b_hr, b_hz folded)
    whh_ref: (Hp, 3*Hp)         W_hh^T, gate blocks lane-aligned at multiples of Hp
    bhn_ref: (1, Hp)            b_hn
    h_ref  : (bb, Hp)           output block == resident hidden-state carry
    """
    c = pl.program_id(1)          # time-chunk index (axis 1 is the sequential axis)

    @pl.when(c == 0)
    def _():
        h_ref[...] = jnp.zeros_like(h_ref)

    bb = h_ref.shape[0]
    # Hoisted out of the time loop (JAX does not CSE broadcast_in_dim).
    bhn = jnp.broadcast_to(bhn_ref[...], (bb, Hp))

    has_tail = (T % chunk) != 0

    def step(t, h):
        gi = gi_ref[t].astype(jnp.float32)                       # (bb, 3*Hp)
        # W_hh^T is deliberately read from VMEM inside the dot: do NOT hoist it
        # into vregs before the (unrolled) loop -- ~48 vregs live across every
        # step would force spills and dominate the vld/vst slots.
        gh = jnp.dot(h.astype(compute_dtype), whh_ref[...],
                     preferred_element_type=jnp.float32)          # (bb, 3*Hp)
        # Gate slices start at 0, Hp, 2*Hp -> whole 128-lane blocks, no relayout.
        r = jax.nn.sigmoid(gi[:, 0:Hp] + gh[:, 0:Hp])
        z = jax.nn.sigmoid(gi[:, Hp:2 * Hp] + gh[:, Hp:2 * Hp])
        n = jnp.tanh(gi[:, 2 * Hp:3 * Hp] + r * (gh[:, 2 * Hp:3 * Hp] + bhn))
        h_new = (1.0 - z) * n + z * h
        if has_tail:
            # Tail guard: the last chunk may run past T (grid = cdiv(T, chunk)).
            h_new = jnp.where(c * chunk + t < T, h_new, h)
        return h_new

    # Partial unroll keeps LLO scheduling visibility with bounded reg pressure.
    h = jax.lax.fori_loop(0, chunk, step, h_ref[...], unroll=min(8, chunk))
    h_ref[...] = h


def gru_forward(x_ncl, params, *, compute_dtype=jnp.float32,
                max_chunk=512, gi_vmem_budget=12 * 1024 * 1024):
    """x_ncl: (B, input_size, seq_len) float32 (same layout as the PyTorch input).

    compute_dtype: jnp.float32 (default; matches the 1e-5 reference check) or
    jnp.bfloat16 (opt-in; halves W_hh / gi VMEM and runs the recurrent matmul at
    native MXU rate, accumulation stays f32).
    """
    w_ih, w_hh, b_ih, b_hh, w_fc, b_fc = params
    B, I, T = x_ncl.shape
    H = w_hh.shape[1]
    # Lane-align each gate block. (On v6e/v7x, rounding to 256 would fill the
    # 256x256 MXU better once H is large; 128 is optimal on v5e and minimal here.)
    Hp = _round_up(H, 128)
    G3 = 3 * Hp

    def pad_gate_cols(w_t):           # (rows, 3H) -> (rows, 3*Hp), per-gate zero pad
        parts = [jnp.pad(w_t[:, g * H:(g + 1) * H], ((0, 0), (0, Hp - H)))
                 for g in range(3)]
        return jnp.concatenate(parts, axis=1)

    def pad_vec(v):                   # (H,) -> (Hp,)
        return jnp.pad(v, (0, Hp - H))

    wih_t = pad_gate_cols(jnp.transpose(w_ih))                                   # (I, 3Hp)
    whh_t = jnp.pad(pad_gate_cols(jnp.transpose(w_hh)),
                    ((0, Hp - H), (0, 0))).astype(compute_dtype)                  # (Hp, 3Hp)

    # Fold b_ir+b_hr and b_iz+b_hz into the precomputed input projection;
    # keep b_hn separate (it sits inside r * (...)).
    gi_bias = jnp.concatenate([
        pad_vec(b_ih[:H] + b_hh[:H]),
        pad_vec(b_ih[H:2 * H] + b_hh[H:2 * H]),
        pad_vec(b_ih[2 * H:]),
    ])                                                                            # (3Hp,)
    bhn = pad_vec(b_hh[2 * H:])[None, :].astype(jnp.float32)                      # (1, Hp)

    # Hoisted input projection: one large lane-dense matmul straight from the
    # original (B, I, T) layout -> (T, B, 3Hp). Removes W_ih from the serial path.
    gi_all = (jnp.einsum('bit,ig->tbg', x_ncl, wih_t,
                         preferred_element_type=jnp.float32)
              + gi_bias).astype(compute_dtype)

    # ---- Batch blocking: a 'parallel' grid axis so v7x's second TensorCore can
    # take half the batch. At B=2 this is a single full-batch block (and the MXU
    # M dimension is badly under-filled: fuse independent sequences if possible).
    bb = (B // 2) if (B % 16 == 0) else B      # B//2 is a multiple of 8, else full B
    nb = B // bb

    # ---- Time chunking: VMEM-budgeted, robust to non-divisor / odd / prime T.
    itemsize = jnp.dtype(compute_dtype).itemsize
    bytes_per_step = 2 * bb * G3 * itemsize    # gi chunk is double-buffered by default
    chunk = int(max(1, min(max_chunk, T, gi_vmem_budget // bytes_per_step)))
    n_chunks = -(-T // chunk)
    Tp = n_chunks * chunk
    if Tp != T:
        gi_all = jnp.pad(gi_all, ((0, Tp - T), (0, 0), (0, 0)))

    kernel = functools.partial(_gru_recurrence_kernel, chunk, Hp, T, compute_dtype)

    grid_spec = pltpu.PrefetchScalarGridSpec(
        num_scalar_prefetch=0,
        grid=(nb, n_chunks),
        in_specs=[
            # gi chunk: lane-dense, streamed (default double buffering).
            pl.BlockSpec((chunk, bb, G3), lambda b, c: (c, b, 0)),
            # Constant-index operands: single buffer, no pointless 2x VMEM.
            pl.BlockSpec((Hp, G3), lambda b, c: (0, 0),
                         pipeline_mode=pl.Buffered(1)),
            pl.BlockSpec((1, Hp), lambda b, c: (0, 0),
                         pipeline_mode=pl.Buffered(1)),
        ],
        # Constant over the time axis: the output block stays resident and is the
        # hidden-state carry. Its index_map must stay time-independent.
        out_specs=pl.BlockSpec((bb, Hp), lambda b, c: (b, 0)),
    )

    h_pad = pl.pallas_call(
        kernel,
        grid_spec=grid_spec,
        out_shape=jax.ShapeDtypeStruct((B, Hp), jnp.float32),
        compiler_params=pltpu.CompilerParams(
            dimension_semantics=("parallel", "arbitrary"),
            vmem_limit_bytes=32 * 1024 * 1024),
    )(gi_all, whh_t, bhn)

    # FC head in XLA (an N=1 output is lane-sparse and wastes an MXU pass in-kernel).
    h_last = h_pad[:, :H]
    return h_last @ jnp.transpose(w_fc) + b_fc


def _reference(x_ncl, params):
    """Pure-JAX reference matching torch.nn.GRU (gate order r,z,n) + Linear."""
    w_ih, w_hh, b_ih, b_hh, w_fc, b_fc = params
    x = jnp.transpose(x_ncl, (0, 2, 1))  # (B, T, I)
    B, T, I = x.shape
    H = w_hh.shape[1]
    h0 = jnp.zeros((B, H), jnp.float32)

    def step(h, x_t):
        gi = x_t @ w_ih.T + b_ih
        gh = h @ w_hh.T + b_hh
        i_r, i_z, i_n = gi[:, :H], gi[:, H:2 * H], gi[:, 2 * H:]
        h_r, h_z, h_n = gh[:, :H], gh[:, H:2 * H], gh[:, 2 * H:]
        r = jax.nn.sigmoid(i_r + h_r)
        z = jax.nn.sigmoid(i_z + h_z)
        n = jnp.tanh(i_n + r * h_n)
        return (1.0 - z) * n + z * h, None

    h_last, _ = jax.lax.scan(step, h0, jnp.transpose(x, (1, 0, 2)))
    return h_last @ w_fc.T + b_fc


def init_params(key, input_size, hidden_size, output_size):
    """Deterministic init mimicking PyTorch's U(-1/sqrt(H), 1/sqrt(H))."""
    ks = jax.random.split(key, 6)
    s = 1.0 / np.sqrt(hidden_size)
    w_ih = jax.random.uniform(ks[0], (3 * hidden_size, input_size), jnp.float32, -s, s)
    w_hh = jax.random.uniform(ks[1], (3 * hidden_size, hidden_size), jnp.float32, -s, s)
    b_ih = jax.random.uniform(ks[2], (3 * hidden_size,), jnp.float32, -s, s)
    b_hh = jax.random.uniform(ks[3], (3 * hidden_size,), jnp.float32, -s, s)
    w_fc = jax.random.uniform(ks[4], (output_size, hidden_size), jnp.float32, -s, s)
    b_fc = jax.random.uniform(ks[5], (output_size,), jnp.float32, -s, s)
    return (w_ih, w_hh, b_ih, b_hh, w_fc, b_fc)


if __name__ == "__main__":
    B, input_size, seq_len, hidden_size, output_size = 2, 4, 8, 32, 1

    key = jax.random.PRNGKey(0)
    k_x, k_p = jax.random.split(key)
    x = jax.random.normal(k_x, (B, input_size, seq_len), jnp.float32)
    params = init_params(k_p, input_size, hidden_size, output_size)

    out = gru_forward(x, params)
    out = jax.block_until_ready(out)

    ref = _reference(x, params)
    assert out.shape == (B, output_size)
    np.testing.assert_allclose(np.asarray(out), np.asarray(ref), rtol=1e-5, atol=1e-5)

    print("KERNEL_OK")
</pallas_src>

<mosaic_0001>
module attributes {stable_mosaic.version = 11 : i64} {
  func.func @_gru_recurrence_kernel(%arg0: i32, %arg1: i32, %arg2: memref<8x2x384xf32, #tpu.memory_space<vmem>>, %arg3: memref<128x384xf32, #tpu.memory_space<vmem>>, %arg4: memref<1x128xf32, #tpu.memory_space<vmem>>, %arg5: memref<2x128xf32, #tpu.memory_space<vmem>>) attributes {dimension_semantics = [#tpu.dimension_semantics<parallel>, #tpu.dimension_semantics<arbitrary>], iteration_bounds = array<i64: 1, 1>, scalar_prefetch = 0 : i64, scratch_operands = 0 : i64, tpu.core_type = #tpu.core_type<tc>, window_params = [{transform_indices = @transform_0, window_bounds = array<i64: 8, 2, 384>}, {pipeline_mode = #tpu.pipeline_mode<synchronous>, transform_indices = @transform_1, window_bounds = array<i64: 128, 384>}, {pipeline_mode = #tpu.pipeline_mode<synchronous>, transform_indices = @transform_2, window_bounds = array<i64: 1, 128>}, {transform_indices = @transform_3, window_bounds = array<i64: 2, 128>}]} {
    %c0_i32 = arith.constant 0 : i32
    %0 = arith.cmpi eq, %arg1, %c0_i32 : i32
    %1 = arith.extui %0 : i1 to i32
    %c0_i32_0 = arith.constant 0 : i32
    %2 = arith.cmpi ne, %1, %c0_i32_0 : i32
    scf.if %2 {
      %cst_70 = arith.constant 0.000000e+00 : f32
      %264 = vector.broadcast %cst_70 : f32 to vector<2x128xf32>
      %c0_71 = arith.constant 0 : index
      %c0_72 = arith.constant 0 : index
      %265 = vector.load %arg5[%c0_71, %c0_72] : memref<2x128xf32, #tpu.memory_space<vmem>>, vector<2x128xf32>
      tpu.vector_store %arg5[%c0_71, %c0_72], %264 {strides = array<i32>} : memref<2x128xf32, #tpu.memory_space<vmem>>, vector<2x128xf32>,
    } else {
    }
    %c0 = arith.constant 0 : index
    %c0_1 = arith.constant 0 : index
    %3 = vector.load %arg4[%c0, %c0_1] : memref<1x128xf32, #tpu.memory_space<vmem>>, vector<1x128xf32>
    %4 = vector.shape_cast %3 : vector<1x128xf32> to vector<1x128xf32>
    %5 = vector.broadcast %4 : vector<1x128xf32> to vector<2x128xf32>
    %c0_2 = arith.constant 0 : index
    %c0_3 = arith.constant 0 : index
    %6 = vector.load %arg5[%c0_2, %c0_3] : memref<2x128xf32, #tpu.memory_space<vmem>>, vector<2x128xf32>
    %c0_i32_4 = arith.constant 0 : i32
    %7 = arith.index_cast %c0_i32_4 : i32 to index
    %c0_5 = arith.constant 0 : index
    %c0_6 = arith.constant 0 : index
    %8 = vector.load %arg2[%7, %c0_5, %c0_6] : memref<8x2x384xf32, #tpu.memory_space<vmem>>, vector<1x2x384xf32>
    %9 = vector.shape_cast %8 : vector<1x2x384xf32> to vector<2x384xf32>
    %c0_7 = arith.constant 0 : index
    %c0_8 = arith.constant 0 : index
    %10 = vector.load %arg3[%c0_7, %c0_8] : memref<128x384xf32, #tpu.memory_space<vmem>>, vector<128x384xf32>
    %cst = arith.constant dense<0.000000e+00> : vector<2x384xf32>
    %11 = tpu.matmul %6, %10, %cst {dimension_numbers = #tpu.dot_dimension_numbers<[1], [0], [0], [1], [0, 0, 1, 1], [], []>} : vector<2x128xf32>, vector<128x384xf32>, vector<2x384xf32> -> vector<2x384xf32>
    %12 = vector.extract_strided_slice %9 {offsets = [0, 0], sizes = [2, 128], strides = [1, 1]} : vector<2x384xf32> to vector<2x128xf32>
    %13 = vector.extract_strided_slice %11 {offsets = [0, 0], sizes = [2, 128], strides = [1, 1]} : vector<2x384xf32> to vector<2x128xf32>
    %14 = arith.addf %12, %13 : vector<2x128xf32>
    %15 = arith.negf %14 : vector<2x128xf32>
    %16 = math.exp %15 : vector<2x128xf32>
    %cst_9 = arith.constant 1.000000e+00 : f32
    %17 = vector.broadcast %cst_9 : f32 to vector<2x128xf32>
    %18 = arith.addf %17, %16 : vector<2x128xf32>
    %19 = arith.divf %17, %18 : vector<2x128xf32>
    %20 = vector.extract_strided_slice %9 {offsets = [0, 128], sizes = [2, 128], strides = [1, 1]} : vector<2x384xf32> to vector<2x128xf32>
    %21 = vector.extract_strided_slice %11 {offsets = [0, 128], sizes = [2, 128], strides = [1, 1]} : vector<2x384xf32> to vector<2x128xf32>
    %22 = arith.addf %20, %21 : vector<2x128xf32>
    %23 = arith.negf %22 : vector<2x128xf32>
    %24 = math.exp %23 : vector<2x128xf32>
    %cst_10 = arith.constant 1.000000e+00 : f32
    %25 = vector.broadcast %cst_10 : f32 to vector<2x128xf32>
    %26 = arith.addf %25, %24 : vector<2x128xf32>
    %27 = arith.divf %25, %26 : vector<2x128xf32>
    %28 = vector.extract_strided_slice %9 {offsets = [0, 256], sizes = [2, 128], strides = [1, 1]} : vector<2x384xf32> to vector<2x128xf32>
    %29 = vector.extract_strided_slice %11 {offsets = [0, 256], sizes = [2, 128], strides = [1, 1]} : vector<2x384xf32> to vector<2x128xf32>
    %30 = arith.addf %29, %5 : vector<2x128xf32>
    %31 = arith.mulf %19, %30 : vector<2x128xf32>
    %32 = arith.addf %28, %31 : vector<2x128xf32>
    %33 = math.tanh %32 : vector<2x128xf32>
    %cst_11 = arith.constant 1.000000e+00 : f32
    %34 = vector.broadcast %cst_11 : f32 to vector<2x128xf32>
    %35 = arith.subf %34, %27 : vector<2x128xf32>
    %36 = arith.mulf %35, %33 : vector<2x128xf32>
    %37 = arith.mulf %27, %6 : vector<2x128xf32>
    %38 = arith.addf %36, %37 : vector<2x128xf32>
    %c1_i32 = arith.constant 1 : i32
    %39 = arith.index_cast %c1_i32 : i32 to index
    %c0_12 = arith.constant 0 : index
    %c0_13 = arith.constant 0 : index
    %40 = vector.load %arg2[%39, %c0_12, %c0_13] : memref<8x2x384xf32, #tpu.memory_space<vmem>>, vector<1x2x384xf32>
    %41 = vector.shape_cast %40 : vector<1x2x384xf32> to vector<2x384xf32>
    %c0_14 = arith.constant 0 : index
    %c0_15 = arith.constant 0 : index
    %42 = vector.load %arg3[%c0_14, %c0_15] : memref<128x384xf32, #tpu.memory_space<vmem>>, vector<128x384xf32>
    %cst_16 = arith.constant dense<0.000000e+00> : vector<2x384xf32>
    %43 = tpu.matmul %38, %42, %cst_16 {dimension_numbers = #tpu.dot_dimension_numbers<[1], [0], [0], [1], [0, 0, 1, 1], [], []>} : vector<2x128xf32>, vector<128x384xf32>, vector<2x384xf32> -> vector<2x384xf32>
    %44 = vector.extract_strided_slice %41 {offsets = [0, 0], sizes = [2, 128], strides = [1, 1]} : vector<2x384xf32> to vector<2x128xf32>
    %45 = vector.extract_strided_slice %43 {offsets = [0, 0], sizes = [2, 128], strides = [1, 1]} : vector<2x384xf32> to vector<2x128xf32>
    %46 = arith.addf %44, %45 : vector<2x128xf32>
    %47 = arith.negf %46 : vector<2x128xf32>
    %48 = math.exp %47 : vector<2x128xf32>
    %cst_17 = arith.constant 1.000000e+00 : f32
    %49 = vector.broadcast %cst_17 : f32 to vector<2x128xf32>
    %50 = arith.addf %49, %48 : vector<2x128xf32>
    %51 = arith.divf %49, %50 : vector<2x128xf32>
    %52 = vector.extract_strided_slice %41 {offsets = [0, 128], sizes = [2, 128], strides = [1, 1]} : vector<2x384xf32> to vector<2x128xf32>
    %53 = vector.extract_strided_slice %43 {offsets = [0, 128], sizes = [2, 128], strides = [1, 1]} : vector<2x384xf32> to vector<2x128xf32>
    %54 = arith.addf %52, %53 : vector<2x128xf32>
    %55 = arith.negf %54 : vector<2x128xf32>
    %56 = math.exp %55 : vector<2x128xf32>
    %cst_18 = arith.constant 1.000000e+00 : f32
    %57 = vector.broadcast %cst_18 : f32 to vector<2x128xf32>
    %58 = arith.addf %57, %56 : vector<2x128xf32>
    %59 = arith.divf %57, %58 : vector<2x128xf32>
    %60 = vector.extract_strided_slice %41 {offsets = [0, 256], sizes = [2, 128], strides = [1, 1]} : vector<2x384xf32> to vector<2x128xf32>
    %61 = vector.extract_strided_slice %43 {offsets = [0, 256], sizes = [2, 128], strides = [1, 1]} : vector<2x384xf32> to vector<2x128xf32>
    %62 = arith.addf %61, %5 : vector<2x128xf32>
    %63 = arith.mulf %51, %62 : vector<2x128xf32>
    %64 = arith.addf %60, %63 : vector<2x128xf32>
    %65 = math.tanh %64 : vector<2x128xf32>
    %cst_19 = arith.constant 1.000000e+00 : f32
    %66 = vector.broadcast %cst_19 : f32 to vector<2x128xf32>
    %67 = arith.subf %66, %59 : vector<2x128xf32>
    %68 = arith.mulf %67, %65 : vector<2x128xf32>
    %69 = arith.mulf %59, %38 : vector<2x128xf32>
    %70 = arith.addf %68, %69 : vector<2x128xf32>
    %c2_i32 = arith.constant 2 : i32
    %71 = arith.index_cast %c2_i32 : i32 to index
    %c0_20 = arith.constant 0 : index
    %c0_21 = arith.constant 0 : index
    %72 = vector.load %arg2[%71, %c0_20, %c0_21] : memref<8x2x384xf32, #tpu.memory_space<vmem>>, vector<1x2x384xf32>
    %73 = vector.shape_cast %72 : vector<1x2x384xf32> to vector<2x384xf32>
    %c0_22 = arith.constant 0 : index
    %c0_23 = arith.constant 0 : index
    %74 = vector.load %arg3[%c0_22, %c0_23] : memref<128x384xf32, #tpu.memory_space<vmem>>, vector<128x384xf32>
    %cst_24 = arith.constant dense<0.000000e+00> : vector<2x384xf32>
    %75 = tpu.matmul %70, %74, %cst_24 {dimension_numbers = #tpu.dot_dimension_numbers<[1], [0], [0], [1], [0, 0, 1, 1], [], []>} : vector<2x128xf32>, vector<128x384xf32>, vector<2x384xf32> -> vector<2x384xf32>
    %76 = vector.extract_strided_slice %73 {offsets = [0, 0], sizes = [2, 128], strides = [1, 1]} : vector<2x384xf32> to vector<2x128xf32>
    %77 = vector.extract_strided_slice %75 {offsets = [0, 0], sizes = [2, 128], strides = [1, 1]} : vector<2x384xf32> to vector<2x128xf32>
    %78 = arith.addf %76, %77 : vector<2x128xf32>
    %79 = arith.negf %78 : vector<2x128xf32>
    %80 = math.exp %79 : vector<2x128xf32>
    %cst_25 = arith.constant 1.000000e+00 : f32
    %81 = vector.broadcast %cst_25 : f32 to vector<2x128xf32>
    %82 = arith.addf %81, %80 : vector<2x128xf32>
    %83 = arith.divf %81, %82 : vector<2x128xf32>
    %84 = vector.extract_strided_slice %73 {offsets = [0, 128], sizes = [2, 128], strides = [1, 1]} : vector<2x384xf32> to vector<2x128xf32>
    %85 = vector.extract_strided_slice %75 {offsets = [0, 128], sizes = [2, 128], strides = [1, 1]} : vector<2x384xf32> to vector<2x128xf32>
    %86 = arith.addf %84, %85 : vector<2x128xf32>
    %87 = arith.negf %86 : vector<2x128xf32>
    %88 = math.exp %87 : vector<2x128xf32>
    %cst_26 = arith.constant 1.000000e+00 : f32
    %89 = vector.broadcast %cst_26 : f32 to vector<2x128xf32>
    %90 = arith.addf %89, %88 : vector<2x128xf32>
    %91 = arith.divf %89, %90 : vector<2x128xf32>
    %92 = vector.extract_strided_slice %73 {offsets = [0, 256], sizes = [2, 128], strides = [1, 1]} : vector<2x384xf32> to vector<2x128xf32>
    %93 = vector.extract_strided_slice %75 {offsets = [0, 256], sizes = [2, 128], strides = [1, 1]} : vector<2x384xf32> to vector<2x128xf32>
    %94 = arith.addf %93, %5 : vector<2x128xf32>
    %95 = arith.mulf %83, %94 : vector<2x128xf32>
    %96 = arith.addf %92, %95 : vector<2x128xf32>
    %97 = math.tanh %96 : vector<2x128xf32>
    %cst_27 = arith.constant 1.000000e+00 : f32
    %98 = vector.broadcast %cst_27 : f32 to vector<2x128xf32>
    %99 = arith.subf %98, %91 : vector<2x128xf32>
    %100 = arith.mulf %99, %97 : vector<2x128xf32>
    %101 = arith.mulf %91, %70 : vector<2x128xf32>
    %102 = arith.addf %100, %101 : vector<2x128xf32>
    %c3_i32 = arith.constant 3 : i32
    %103 = arith.index_cast %c3_i32 : i32 to index
    %c0_28 = arith.constant 0 : index
    %c0_29 = arith.constant 0 : index
    %104 = vector.load %arg2[%103, %c0_28, %c0_29] : memref<8x2x384xf32, #tpu.memory_space<vmem>>, vector<1x2x384xf32>
    %105 = vector.shape_cast %104 : vector<1x2x384xf32> to vector<2x384xf32>
    %c0_30 = arith.constant 0 : index
    %c0_31 = arith.constant 0 : index
    %106 = vector.load %arg3[%c0_30, %c0_31] : memref<128x384xf32, #tpu.memory_space<vmem>>, vector<128x384xf32>
    %cst_32 = arith.constant dense<0.000000e+00> : vector<2x384xf32>
    %107 = tpu.matmul %102, %106, %cst_32 {dimension_numbers = #tpu.dot_dimension_numbers<[1], [0], [0], [1], [0, 0, 1, 1], [], []>} : vector<2x128xf32>, vector<128x384xf32>, vector<2x384xf32> -> vector<2x384xf32>
    %108 = vector.extract_strided_slice %105 {offsets = [0, 0], sizes = [2, 128], strides = [1, 1]} : vector<2x384xf32> to vector<2x128xf32>
    %109 = vector.extract_strided_slice %107 {offsets = [0, 0], sizes = [2, 128], strides = [1, 1]} : vector<2x384xf32> to vector<2x128xf32>
    %110 = arith.addf %108, %109 : vector<2x128xf32>
    %111 = arith.negf %110 : vector<2x128xf32>
    %112 = math.exp %111 : vector<2x128xf32>
    %cst_33 = arith.constant 1.000000e+00 : f32
    %113 = vector.broadcast %cst_33 : f32 to vector<2x128xf32>
    %114 = arith.addf %113, %112 : vector<2x128xf32>
    %115 = arith.divf %113, %114 : vector<2x128xf32>
    %116 = vector.extract_strided_slice %105 {offsets = [0, 128], sizes = [2, 128], strides = [1, 1]} : vector<2x384xf32> to vector<2x128xf32>
    %117 = vector.extract_strided_slice %107 {offsets = [0, 128], sizes = [2, 128], strides = [1, 1]} : vector<2x384xf32> to vector<2x128xf32>
    %118 = arith.addf %116, %117 : vector<2x128xf32>
    %119 = arith.negf %118 : vector<2x128xf32>
    %120 = math.exp %119 : vector<2x128xf32>
    %cst_34 = arith.constant 1.000000e+00 : f32
    %121 = vector.broadcast %cst_34 : f32 to vector<2x128xf32>
    %122 = arith.addf %121, %120 : vector<2x128xf32>
    %123 = arith.divf %121, %122 : vector<2x128xf32>
    %124 = vector.extract_strided_slice %105 {offsets = [0, 256], sizes = [2, 128], strides = [1, 1]} : vector<2x384xf32> to vector<2x128xf32>
    %125 = vector.extract_strided_slice %107 {offsets = [0, 256], sizes = [2, 128], strides = [1, 1]} : vector<2x384xf32> to vector<2x128xf32>
    %126 = arith.addf %125, %5 : vector<2x128xf32>
    %127 = arith.mulf %115, %126 : vector<2x128xf32>
    %128 = arith.addf %124, %127 : vector<2x128xf32>
    %129 = math.tanh %128 : vector<2x128xf32>
    %cst_35 = arith.constant 1.000000e+00 : f32
    %130 = vector.broadcast %cst_35 : f32 to vector<2x128xf32>
    %131 = arith.subf %130, %123 : vector<2x128xf32>
    %132 = arith.mulf %131, %129 : vector<2x128xf32>
    %133 = arith.mulf %123, %102 : vector<2x128xf32>
    %134 = arith.addf %132, %133 : vector<2x128xf32>
    %c4_i32 = arith.constant 4 : i32
    %135 = arith.index_cast %c4_i32 : i32 to index
    %c0_36 = arith.constant 0 : index
    %c0_37 = arith.constant 0 : index
    %136 = vector.load %arg2[%135, %c0_36, %c0_37] : memref<8x2x384xf32, #tpu.memory_space<vmem>>, vector<1x2x384xf32>
    %137 = vector.shape_cast %136 : vector<1x2x384xf32> to vector<2x384xf32>
    %c0_38 = arith.constant 0 : index
    %c0_39 = arith.constant 0 : index
    %138 = vector.load %arg3[%c0_38, %c0_39] : memref<128x384xf32, #tpu.memory_space<vmem>>, vector<128x384xf32>
    %cst_40 = arith.constant dense<0.000000e+00> : vector<2x384xf32>
    %139 = tpu.matmul %134, %138, %cst_40 {dimension_numbers = #tpu.dot_dimension_numbers<[1], [0], [0], [1], [0, 0, 1, 1], [], []>} : vector<2x128xf32>, vector<128x384xf32>, vector<2x384xf32> -> vector<2x384xf32>
    %140 = vector.extract_strided_slice %137 {offsets = [0, 0], sizes = [2, 128], strides = [1, 1]} : vector<2x384xf32> to vector<2x128xf32>
    %141 = vector.extract_strided_slice %139 {offsets = [0, 0], sizes = [2, 128], strides = [1, 1]} : vector<2x384xf32> to vector<2x128xf32>
    %142 = arith.addf %140, %141 : vector<2x128xf32>
    %143 = arith.negf %142 : vector<2x128xf32>
    %144 = math.exp %143 : vector<2x128xf32>
    %cst_41 = arith.constant 1.000000e+00 : f32
    %145 = vector.broadcast %cst_41 : f32 to vector<2x128xf32>
    %146 = arith.addf %145, %144 : vector<2x128xf32>
    %147 = arith.divf %145, %146 : vector<2x128xf32>
    %148 = vector.extract_strided_slice %137 {offsets = [0, 128], sizes = [2, 128], strides = [1, 1]} : vector<2x384xf32> to vector<2x128xf32>
    %149 = vector.extract_strided_slice %139 {offsets = [0, 128], sizes = [2, 128], strides = [1, 1]} : vector<2x384xf32> to vector<2x128xf32>
    %150 = arith.addf %148, %149 : vector<2x128xf32>
    %151 = arith.negf %150 : vector<2x128xf32>
    %152 = math.exp %151 : vector<2x128xf32>
    %cst_42 = arith.constant 1.000000e+00 : f32
    %153 = vector.broadcast %cst_42 : f32 to vector<2x128xf32>
    %154 = arith.addf %153, %152 : vector<2x128xf32>
    %155 = arith.divf %153, %154 : vector<2x128xf32>
    %156 = vector.extract_strided_slice %137 {offsets = [0, 256], sizes = [2, 128], strides = [1, 1]} : vector<2x384xf32> to vector<2x128xf32>
    %157 = vector.extract_strided_slice %139 {offsets = [0, 256], sizes = [2, 128], strides = [1, 1]} : vector<2x384xf32> to vector<2x128xf32>
    %158 = arith.addf %157, %5 : vector<2x128xf32>
    %159 = arith.mulf %147, %158 : vector<2x128xf32>
    %160 = arith.addf %156, %159 : vector<2x128xf32>
    %161 = math.tanh %160 : vector<2x128xf32>
    %cst_43 = arith.constant 1.000000e+00 : f32
    %162 = vector.broadcast %cst_43 : f32 to vector<2x128xf32>
    %163 = arith.subf %162, %155 : vector<2x128xf32>
    %164 = arith.mulf %163, %161 : vector<2x128xf32>
    %165 = arith.mulf %155, %134 : vector<2x128xf32>
    %166 = arith.addf %164, %165 : vector<2x128xf32>
    %c5_i32 = arith.constant 5 : i32
    %167 = arith.index_cast %c5_i32 : i32 to index
    %c0_44 = arith.constant 0 : index
    %c0_45 = arith.constant 0 : index
    %168 = vector.load %arg2[%167, %c0_44, %c0_45] : memref<8x2x384xf32, #tpu.memory_space<vmem>>, vector<1x2x384xf32>
    %169 = vector.shape_cast %168 : vector<1x2x384xf32> to vector<2x384xf32>
    %c0_46 = arith.constant 0 : index
    %c0_47 = arith.constant 0 : index
    %170 = vector.load %arg3[%c0_46, %c0_47] : memref<128x384xf32, #tpu.memory_space<vmem>>, vector<128x384xf32>
    %cst_48 = arith.constant dense<0.000000e+00> : vector<2x384xf32>
    %171 = tpu.matmul %166, %170, %cst_48 {dimension_numbers = #tpu.dot_dimension_numbers<[1], [0], [0], [1], [0, 0, 1, 1], [], []>} : vector<2x128xf32>, vector<128x384xf32>, vector<2x384xf32> -> vector<2x384xf32>
    %172 = vector.extract_strided_slice %169 {offsets = [0, 0], sizes = [2, 128], strides = [1, 1]} : vector<2x384xf32> to vector<2x128xf32>
    %173 = vector.extract_strided_slice %171 {offsets = [0, 0], sizes = [2, 128], strides = [1, 1]} : vector<2x384xf32> to vector<2x128xf32>
    %174 = arith.addf %172, %173 : vector<2x128xf32>
    %175 = arith.negf %174 : vector<2x128xf32>
    %176 = math.exp %175 : vector<2x128xf32>
    %cst_49 = arith.constant 1.000000e+00 : f32
    %177 = vector.broadcast %cst_49 : f32 to vector<2x128xf32>
    %178 = arith.addf %177, %176 : vector<2x128xf32>
    %179 = arith.divf %177, %178 : vector<2x128xf32>
    %180 = vector.extract_strided_slice %169 {offsets = [0, 128], sizes = [2, 128], strides = [1, 1]} : vector<2x384xf32> to vector<2x128xf32>
    %181 = vector.extract_strided_slice %171 {offsets = [0, 128], sizes = [2, 128], strides = [1, 1]} : vector<2x384xf32> to vector<2x128xf32>
    %182 = arith.addf %180, %181 : vector<2x128xf32>
    %183 = arith.negf %182 : vector<2x128xf32>
    %184 = math.exp %183 : vector<2x128xf32>
    %cst_50 = arith.constant 1.000000e+00 : f32
    %185 = vector.broadcast %cst_50 : f32 to vector<2x128xf32>
    %186 = arith.addf %185, %184 : vector<2x128xf32>
    %187 = arith.divf %185, %186 : vector<2x128xf32>
    %188 = vector.extract_strided_slice %169 {offsets = [0, 256], sizes = [2, 128], strides = [1, 1]} : vector<2x384xf32> to vector<2x128xf32>
    %189 = vector.extract_strided_slice %171 {offsets = [0, 256], sizes = [2, 128], strides = [1, 1]} : vector<2x384xf32> to vector<2x128xf32>
    %190 = arith.addf %189, %5 : vector<2x128xf32>
    %191 = arith.mulf %179, %190 : vector<2x128xf32>
    %192 = arith.addf %188, %191 : vector<2x128xf32>
    %193 = math.tanh %192 : vector<2x128xf32>
    %cst_51 = arith.constant 1.000000e+00 : f32
    %194 = vector.broadcast %cst_51 : f32 to vector<2x128xf32>
    %195 = arith.subf %194, %187 : vector<2x128xf32>
    %196 = arith.mulf %195, %193 : vector<2x128xf32>
    %197 = arith.mulf %187, %166 : vector<2x128xf32>
    %198 = arith.addf %196, %197 : vector<2x128xf32>
    %c6_i32 = arith.constant 6 : i32
    %199 = arith.index_cast %c6_i32 : i32 to index
    %c0_52 = arith.constant 0 : index
    %c0_53 = arith.constant 0 : index
    %200 = vector.load %arg2[%199, %c0_52, %c0_53] : memref<8x2x384xf32, #tpu.memory_space<vmem>>, vector<1x2x384xf32>
    %201 = vector.shape_cast %200 : vector<1x2x384xf32> to vector<2x384xf32>
    %c0_54 = arith.constant 0 : index
    %c0_55 = arith.constant 0 : index
    %202 = vector.load %arg3[%c0_54, %c0_55] : memref<128x384xf32, #tpu.memory_space<vmem>>, vector<128x384xf32>
    %cst_56 = arith.constant dense<0.000000e+00> : vector<2x384xf32>
    %203 = tpu.matmul %198, %202, %cst_56 {dimension_numbers = #tpu.dot_dimension_numbers<[1], [0], [0], [1], [0, 0, 1, 1], [], []>} : vector<2x128xf32>, vector<128x384xf32>, vector<2x384xf32> -> vector<2x384xf32>
    %204 = vector.extract_strided_slice %201 {offsets = [0, 0], sizes = [2, 128], strides = [1, 1]} : vector<2x384xf32> to vector<2x128xf32>
    %205 = vector.extract_strided_slice %203 {offsets = [0, 0], sizes = [2, 128], strides = [1, 1]} : vector<2x384xf32> to vector<2x128xf32>
    %206 = arith.addf %204, %205 : vector<2x128xf32>
    %207 = arith.negf %206 : vector<2x128xf32>
    %208 = math.exp %207 : vector<2x128xf32>
    %cst_57 = arith.constant 1.000000e+00 : f32
    %209 = vector.broadcast %cst_57 : f32 to vector<2x128xf32>
    %210 = arith.addf %209, %208 : vector<2x128xf32>
    %211 = arith.divf %209, %210 : vector<2x128xf32>
    %212 = vector.extract_strided_slice %201 {offsets = [0, 128], sizes = [2, 128], strides = [1, 1]} : vector<2x384xf32> to vector<2x128xf32>
    %213 = vector.extract_strided_slice %203 {offsets = [0, 128], sizes = [2, 128], strides = [1, 1]} : vector<2x384xf32> to vector<2x128xf32>
    %214 = arith.addf %212, %213 : vector<2x128xf32>
    %215 = arith.negf %214 : vector<2x128xf32>
    %216 = math.exp %215 : vector<2x128xf32>
    %cst_58 = arith.constant 1.000000e+00 : f32
    %217 = vector.broadcast %cst_58 : f32 to vector<2x128xf32>
    %218 = arith.addf %217, %216 : vector<2x128xf32>
    %219 = arith.divf %217, %218 : vector<2x128xf32>
    %220 = vector.extract_strided_slice %201 {offsets = [0, 256], sizes = [2, 128], strides = [1, 1]} : vector<2x384xf32> to vector<2x128xf32>
    %221 = vector.extract_strided_slice %203 {offsets = [0, 256], sizes = [2, 128], strides = [1, 1]} : vector<2x384xf32> to vector<2x128xf32>
    %222 = arith.addf %221, %5 : vector<2x128xf32>
    %223 = arith.mulf %211, %222 : vector<2x128xf32>
    %224 = arith.addf %220, %223 : vector<2x128xf32>
    %225 = math.tanh %224 : vector<2x128xf32>
    %cst_59 = arith.constant 1.000000e+00 : f32
    %226 = vector.broadcast %cst_59 : f32 to vector<2x128xf32>
    %227 = arith.subf %226, %219 : vector<2x128xf32>
    %228 = arith.mulf %227, %225 : vector<2x128xf32>
    %229 = arith.mulf %219, %198 : vector<2x128xf32>
    %230 = arith.addf %228, %229 : vector<2x128xf32>
    %c7_i32 = arith.constant 7 : i32
    %231 = arith.index_cast %c7_i32 : i32 to index
    %c0_60 = arith.constant 0 : index
    %c0_61 = arith.constant 0 : index
    %232 = vector.load %arg2[%231, %c0_60, %c0_61] : memref<8x2x384xf32, #tpu.memory_space<vmem>>, vector<1x2x384xf32>
    %233 = vector.shape_cast %232 : vector<1x2x384xf32> to vector<2x384xf32>
    %c0_62 = arith.constant 0 : index
    %c0_63 = arith.constant 0 : index
    %234 = vector.load %arg3[%c0_62, %c0_63] : memref<128x384xf32, #tpu.memory_space<vmem>>, vector<128x384xf32>
    %cst_64 = arith.constant dense<0.000000e+00> : vector<2x384xf32>
    %235 = tpu.matmul %230, %234, %cst_64 {dimension_numbers = #tpu.dot_dimension_numbers<[1], [0], [0], [1], [0, 0, 1, 1], [], []>} : vector<2x128xf32>, vector<128x384xf32>, vector<2x384xf32> -> vector<2x384xf32>
    %236 = vector.extract_strided_slice %233 {offsets = [0, 0], sizes = [2, 128], strides = [1, 1]} : vector<2x384xf32> to vector<2x128xf32>
    %237 = vector.extract_strided_slice %235 {offsets = [0, 0], sizes = [2, 128], strides = [1, 1]} : vector<2x384xf32> to vector<2x128xf32>
    %238 = arith.addf %236, %237 : vector<2x128xf32>
    %239 = arith.negf %238 : vector<2x128xf32>
    %240 = math.exp %239 : vector<2x128xf32>
    %cst_65 = arith.constant 1.000000e+00 : f32
    %241 = vector.broadcast %cst_65 : f32 to vector<2x128xf32>
    %242 = arith.addf %241, %240 : vector<2x128xf32>
    %243 = arith.divf %241, %242 : vector<2x128xf32>
    %244 = vector.extract_strided_slice %233 {offsets = [0, 128], sizes = [2, 128], strides = [1, 1]} : vector<2x384xf32> to vector<2x128xf32>
    %245 = vector.extract_strided_slice %235 {offsets = [0, 128], sizes = [2, 128], strides = [1, 1]} : vector<2x384xf32> to vector<2x128xf32>
    %246 = arith.addf %244, %245 : vector<2x128xf32>
    %247 = arith.negf %246 : vector<2x128xf32>
    %248 = math.exp %247 : vector<2x128xf32>
    %cst_66 = arith.constant 1.000000e+00 : f32
    %249 = vector.broadcast %cst_66 : f32 to vector<2x128xf32>
    %250 = arith.addf %249, %248 : vector<2x128xf32>
    %251 = arith.divf %249, %250 : vector<2x128xf32>
    %252 = vector.extract_strided_slice %233 {offsets = [0, 256], sizes = [2, 128], strides = [1, 1]} : vector<2x384xf32> to vector<2x128xf32>
    %253 = vector.extract_strided_slice %235 {offsets = [0, 256], sizes = [2, 128], strides = [1, 1]} : vector<2x384xf32> to vector<2x128xf32>
    %254 = arith.addf %253, %5 : vector<2x128xf32>
    %255 = arith.mulf %243, %254 : vector<2x128xf32>
    %256 = arith.addf %252, %255 : vector<2x128xf32>
    %257 = math.tanh %256 : vector<2x128xf32>
    %cst_67 = arith.constant 1.000000e+00 : f32
    %258 = vector.broadcast %cst_67 : f32 to vector<2x128xf32>
    %259 = arith.subf %258, %251 : vector<2x128xf32>
    %260 = arith.mulf %259, %257 : vector<2x128xf32>
    %261 = arith.mulf %251, %230 : vector<2x128xf32>
    %262 = arith.addf %260, %261 : vector<2x128xf32>
    %c8_i32 = arith.constant 8 : i32
    %c0_68 = arith.constant 0 : index
    %c0_69 = arith.constant 0 : index
    %263 = vector.load %arg5[%c0_68, %c0_69] : memref<2x128xf32, #tpu.memory_space<vmem>>, vector<2x128xf32>
    tpu.vector_store %arg5[%c0_68, %c0_69], %262 {strides = array<i32>} : memref<2x128xf32, #tpu.memory_space<vmem>>, vector<2x128xf32>,
    return
  }
  func.func @transform_0(%arg0: i32, %arg1: i32) -> (i32, i32, i32) {
    %c0_i32 = arith.constant 0 : i32
    %c0_i32_0 = arith.constant 0 : i32
    return %arg1, %arg0, %c0_i32 : i32, i32, i32
  }
  func.func @transform_1(%arg0: i32, %arg1: i32) -> (i32, i32) {
    %c0_i32 = arith.constant 0 : i32
    %c0_i32_0 = arith.constant 0 : i32
    %c0_i32_1 = arith.constant 0 : i32
    return %c0_i32, %c0_i32_0 : i32, i32
  }
  func.func @transform_2(%arg0: i32, %arg1: i32) -> (i32, i32) {
    %c0_i32 = arith.constant 0 : i32
    %c0_i32_0 = arith.constant 0 : i32
    %c0_i32_1 = arith.constant 0 : i32
    return %c0_i32, %c0_i32_0 : i32, i32
  }
  func.func @transform_3(%arg0: i32, %arg1: i32) -> (i32, i32) {
    %c0_i32 = arith.constant 0 : i32
    %c0_i32_0 = arith.constant 0 : i32
    return %arg0, %c0_i32 : i32, i32
  }
}

</mosaic_0001>

<bundles_post_ra>
// kernel: tpu_custom_call.1
= control target key start
LH: loop header
LB: loop body
LE: loop exit
PB: predicated region body
PF: predicated region fallthrough
CT: control target
= control target key end

     0   :  { %8 = vsyncpa [#allocation3], 0  ;;  %s2933_s0 = inlined_call_operand.hbm [shape: f32[8,2,384], index: 0, kind: input, shape index: {}]   ;;  %s2934_s1 = inlined_call_operand.hbm [shape: f32[128,384], index: 1, kind: input, shape index: {}]   ;;  %s2935_s2 = inlined_call_operand.vmem [shape: f32[1,128], index: 2, kind: input, shape index: {}]   ;;  %s2936_s3 = inlined_call_operand.hbm [shape: f32[2,128], index: 3, kind: output, shape index: {}]  }
   0x1   :  { %9 = vsyncpa [#allocation6], 0 }
   0x2   :  { %10 = vsyncpa [#allocation4], 0  ;;  %s2117_s12 = smov [#allocation2]  }
   0x3   :  { %s16_s13 = sshll.u32 %s2117_s12, 4  ;;  %s17_s13 = int_to_ptr.vmem [resolvable:$true] %s16_s13 }
   0x4   :  { %s2059_s14 = scalar_lea.vmem %s17_s13, 768  ;;  %p2064_p1 = scmp.lt.s32.totalorder %s17_s13, %s17_s13 }
   0x5   :  { %p2060_p0 = scmp.ne.s32.totalorder %s17_s13, %s2059_s14  ;;  %p2065_p2 = scmp.lt.s32.totalorder %s2059_s14, %s2059_s14 }
   0x7   :  { %p2066_p3 = por %p2065_p2, %p2064_p1 }
   0x9   :  { %p2067_p4 = pnand %p2066_p3, %p2060_p0 }
   0xb   :  { %2070 = shalt.err (!%p2067_p4)
}
   0xc   :  { %s2118_s15 = smov 96   ;;  %s2119_s16 = smov 6  }
   0xd   :  { %22 = dma.hbm_to_vmem [thread:$0]  %s2933_s0, 768, %s17_s13, [#allocation3], %s2118_s15, %s2118_s15, %s2119_s16  }
   0xe   :  { %s2120_s19 = smov [#allocation5]  }
   0xf   :  { %s28_s20 = sshll.u32 %s2120_s19, 4  ;;  %s29_s20 = int_to_ptr.vmem [resolvable:$true] %s28_s20 }
  0x10   :  { %s2079_s21 = scalar_lea.vmem %s29_s20, 6144  ;;  %p2084_p6 = scmp.lt.s32.totalorder %s29_s20, %s29_s20 }
  0x11   :  { %p2080_p5 = scmp.ne.s32.totalorder %s29_s20, %s2079_s21  ;;  %p2085_p7 = scmp.lt.s32.totalorder %s2079_s21, %s2079_s21 }
  0x13   :  { %p2086_p8 = por %p2085_p7, %p2084_p6 }
  0x15   :  { %p2087_p9 = pnand %p2086_p8, %p2080_p5 }
  0x17   :  { %2090 = shalt.err (!%p2087_p9)
}
  0x18   :  { %s2121_s22 = smov 384   ;;  %s2122_s23 = smov 24  }
  0x19   :  { %34 = dma.hbm_to_vmem [thread:$0]  %s2934_s1, 6144, %s29_s20, [#allocation6], %s2121_s22, %s2121_s22, %s2122_s23  }
  0x1a   :  { %2111 = dma.done.wait [#allocation3], 768  }
  0x1b   :  { %2112 = vsyncadd [#allocation3], 4294966528 }
  0x1c   :  { %2113 = dma.done.wait [#allocation6], 6144  }
  0x1d   :  { %2114 = vsyncadd [#allocation6], 4294961152  ;;  %v2937_v0 = vmov 0.0   ;;  %vm2124_vm0 = vmmov 0   ;;  %v2157_v1 = vld [vmem:[#allocation5 + $0x170] sm:$0xff]  ;;  %v2159_v2 = vld [vmem:[#allocation5 + $0x168] sm:$0xff] }
  0x1e   :  { %1633 = vmatprep.subr.mxu1 %v2937_v0  ;;  %47 = vst [vmem:[#allocation7] sm:$0x3] %v2937_v0  ;;  %169 = vmatprep.mubr.f32.mxu0 %v2937_v0  ;;  %2956 = vst [vmem:[#allocation11_spill] sm:$0xff] %v2157_v1  ;;  %v2161_v3 = vld [vmem:[#allocation5 + $0x158] sm:$0xff]  ;;  %v2164_v4 = vld [vmem:[#allocation5 + $0x150] sm:$0xff] }
  0x1f   :  { %1665 = vmatprep.mubr.msk.f32.mxu1 %vm2124_vm0, %v2937_v0  ;;  %105 = vmatprep.subr.mxu0 %v2157_v1  ;;  %v2167_v5 = vld [vmem:[#allocation5 + $0x140] sm:$0xff]  ;;  %v2170_v6 = vld [vmem:[#allocation5 + $0x138] sm:$0xff]  ;;  %v2173_v7 = vld [vmem:[#allocation5 + $0x128] sm:$0xff] }
  0x20   :  { %106 = vmatpush1.msra.mxu0 %v2159_v2  ;;  %v2176_v8 = vld [vmem:[#allocation5 + $0x120] sm:$0xff]  ;;  %v2179_v9 = vld [vmem:[#allocation5 + $0x110] sm:$0xff]  ;;  %v2182_v10 = vld [vmem:[#allocation5 + $0x108] sm:$0xff] }
  0x21   :  { %107 = vmatprep.subr.mxu0 %v2161_v3  ;;  %v2185_v11 = vld [vmem:[#allocation5 + $0xf8] sm:$0xff]  ;;  %v2188_v12 = vld [vmem:[#allocation5 + $0xf0] sm:$0xff]  ;;  %v2191_v13 = vld [vmem:[#allocation5 + $0xe0] sm:$0xff] }
  0x22   :  { %108 = vmatpush1.msra.mxu0 %v2164_v4  ;;  %v2193_v14 = vld [vmem:[#allocation5 + $0x178] sm:$0xff]  ;;  %v2199_v16 = vld [vmem:[#allocation5 + $0x160] sm:$0xff]  ;;  %v2202_v17 = vld [vmem:[#allocation5 + $0xc8] sm:$0xff] }
  0x23   :  { %109 = vmatprep.subr.mxu0 %v2167_v5  ;;  %v2196_v15 = vld [vmem:[#allocation5 + $0xd8] sm:$0xff]  ;;  %1634 = vmatpush3.msra.mxu1 %v2193_v14  ;;  %v2205_v18 = vld [vmem:[#allocation5 + $0x148] sm:$0xff]  ;;  %v2208_v19 = vld [vmem:[#allocation5 + $0xc0] sm:$0xff] }
  0x24   :  { %110 = vmatpush1.msra.mxu0 %v2170_v6  ;;  %1635 = vmatprep.subr.mxu1 %v2937_v0  ;;  %v2212_v20 = vld [vmem:[#allocation5 + $0xb0] sm:$0xff]  ;;  %v2218_v22 = vld [vmem:[#allocation5 + $0xa8] sm:$0xff]  ;;  %v2222_v23 = vld [vmem:[#allocation5 + $0x98] sm:$0xff] }
  0x25   :  { %111 = vmatprep.subr.mxu0 %v2173_v7  ;;  %1636 = vmatpush3.msra.mxu1 %v2199_v16  ;;  %v2215_v21 = vld [vmem:[#allocation5 + $0x130] sm:$0xff]  ;;  %v2225_v24 = vld [vmem:[#allocation5 + $0x118] sm:$0xff]  ;;  %v2232_v26 = vld [vmem:[#allocation5 + $0x80] sm:$0xff] }
  0x26   :  { %112 = vmatpush1.msra.mxu0 %v2176_v8  ;;  %1637 = vmatprep.subr.mxu1 %v2937_v0  ;;  %v2228_v25 = vld [vmem:[#allocation5 + $0x90] sm:$0xff]  ;;  %v2235_v27 = vld [vmem:[#allocation5 + $0x100] sm:$0xff]  ;;  %v2238_v28 = vld [vmem:[#allocation5 + $0x78] sm:$0xff] }
  0x27   :  { %113 = vmatprep.subr.mxu0 %v2179_v9  ;;  %1638 = vmatpush3.msra.mxu1 %v2205_v18  ;;  %v2242_v29 = vld [vmem:[#allocation5 + $0x68] sm:$0xff]  ;;  %v2248_v31 = vld [vmem:[#allocation5 + $0x60] sm:$0xff]  ;;  %v2252_v32 = vld [vmem:[#allocation5 + $0x50] sm:$0xff] }
  0x28   :  { %114 = vmatpush1.msra.mxu0 %v2182_v10  ;;  %1639 = vmatprep.subr.mxu1 %v2937_v0  ;;  %v2245_v30 = vld [vmem:[#allocation5 + $0xe8] sm:$0xff]  ;;  %v2255_v33 = vld [vmem:[#allocation5 + $0xd0] sm:$0xff]  ;;  %v2262_v35 = vld [vmem:[#allocation5 + $0x38] sm:$0xff] }
  0x29   :  { %115 = vmatprep.subr.mxu0 %v2185_v11  ;;  %1640 = vmatpush3.msra.mxu1 %v2215_v21  ;;  %v2258_v34 = vld [vmem:[#allocation5 + $0x48] sm:$0xff]  ;;  %v2265_v36 = vld [vmem:[#allocation5 + $0xb8] sm:$0xff]  ;;  %v2268_v37 = vld [vmem:[#allocation5 + $0x30] sm:$0xff] }
  0x2a   :  { %116 = vmatpush1.msra.mxu0 %v2188_v12  ;;  %1641 = vmatprep.subr.mxu1 %v2937_v0  ;;  %v2272_v38 = vld [vmem:[#allocation5 + $0x20] sm:$0xff]  ;;  %v2278_v40 = vld [vmem:[#allocation5 + $0x18] sm:$0xff]  ;;  %v2282_v41 = vld [vmem:[#allocation5 + $0x8] sm:$0xff] }
  0x2b   :  { %117 = vmatprep.subr.mxu0 %v2191_v13  ;;  %1642 = vmatpush3.msra.mxu1 %v2225_v24  ;;  %v2275_v39 = vld [vmem:[#allocation5 + $0xa0] sm:$0xff]  ;;  %2957 = vst [vmem:[#allocation12_spill] sm:$0xff] %v2278_v40  ;;  %2958 = vst [vmem:[#allocation13_spill] sm:$0xff] %v2282_v41  ;;  %v2285_v42 = vld [vmem:[#allocation5 + $0x88] sm:$0xff] }
  0x2c   :  { %118 = vmatpush1.msra.mxu0 %v2196_v15  ;;  %1643 = vmatprep.subr.mxu1 %v2937_v0  ;;  %v2288_v43 = vld [vmem:[#allocation5] sm:$0xff]  ;;  %v2295_v45 = vld [vmem:[#allocation5 + $0x70] sm:$0xff]  ;;  %v2301_v46 = vld [vmem:[#allocation5 + $0x58] sm:$0xff] }
  0x2d   :  { %119 = vmatprep.subr.mxu0 %v2202_v17  ;;  %1644 = vmatpush3.msra.mxu1 %v2235_v27  ;;  %2959 = vst [vmem:[#allocation14_spill] sm:$0xff] %v2288_v43  ;;  %v2292_v44 = vld [vmem:[#allocation7] sm:$0x3]  ;;  %v2312_v48 = vld [vmem:[#allocation5 + $0x28] sm:$0xff]  ;;  %v2318_v49 = vld [vmem:[#allocation5 + $0x10] sm:$0xff] }
  0x2e   :  { %120 = vmatpush1.msra.mxu0 %v2208_v19  ;;  %1645 = vmatprep.subr.mxu1 %v2937_v0  ;;  %v2306_v47 = vld [vmem:[#allocation5 + $0x40] sm:$0xff]  ;;  %2960 = vst [vmem:[#allocation15_spill] sm:$0xff] %v2312_v48  ;;  %2961 = vst [vmem:[#allocation16_spill] sm:$0xff] %v2318_v49  ;;  %v56_v50 = vld [vmem:[#allocation2] sm:$0x3f] }
  0x2f   :  { %121 = vmatprep.subr.mxu0 %v2212_v20  ;;  %1646 = vmatpush3.msra.mxu1 %v2245_v30  ;;  %v254_v54 = vrot.slane %v56_v50, 2  ;;  %v2392_v63 = vld [vmem:[%s2935_s2] ss:$0 sm:$0xff] }
  0x30   :  { %122 = vmatpush1.msra.mxu0 %v2218_v22  ;;  %1647 = vmatprep.subr.mxu1 %v2937_v0 }
  0x31   :  { %123 = vmatprep.subr.mxu0 %v2222_v23  ;;  %1648 = vmatpush3.msra.mxu1 %v2255_v33 }
  0x32   :  { %124 = vmatpush1.msra.mxu0 %v2228_v25  ;;  %1649 = vmatprep.subr.mxu1 %v2937_v0 }
  0x33   :  { %125 = vmatprep.subr.mxu0 %v2232_v26  ;;  %1650 = vmatpush3.msra.mxu1 %v2265_v36 }
  0x34   :  { %126 = vmatpush1.msra.mxu0 %v2238_v28  ;;  %1651 = vmatprep.subr.mxu1 %v2937_v0 }
  0x35   :  { %127 = vmatprep.subr.mxu0 %v2242_v29  ;;  %1652 = vmatpush3.msra.mxu1 %v2275_v39 }
  0x36   :  { %128 = vmatpush1.msra.mxu0 %v2248_v31  ;;  %1653 = vmatprep.subr.mxu1 %v2937_v0 }
  0x37   :  { %129 = vmatprep.subr.mxu0 %v2252_v32  ;;  %1654 = vmatpush3.msra.mxu1 %v2285_v42 }
  0x38   :  { %130 = vmatpush1.msra.mxu0 %v2258_v34  ;;  %1655 = vmatprep.subr.mxu1 %v2937_v0 }
  0x39   :  { %131 = vmatprep.subr.mxu0 %v2262_v35  ;;  %1656 = vmatpush3.msra.mxu1 %v2295_v45 }
  0x3a   :  { %132 = vmatpush1.msra.mxu0 %v2268_v37  ;;  %1657 = vmatprep.subr.mxu1 %v2937_v0 }
  0x3b   :  { %133 = vmatprep.subr.mxu0 %v2272_v38  ;;  %1658 = vmatpush3.msra.mxu1 %v2301_v46 }
  0x3c   :  { %134 = vmatpush1.msra.mxu0 %v2278_v40  ;;  %1659 = vmatprep.subr.mxu1 %v2937_v0 }
  0x3d   :  { %135 = vmatprep.subr.mxu0 %v2282_v41  ;;  %1660 = vmatpush3.msra.mxu1 %v2306_v47 }
  0x3e   :  { %136 = vmatpush1.msra.mxu0 %v2288_v43  ;;  %1661 = vmatprep.subr.mxu1 %v2937_v0 }
  0x3f   :  { %170 = vmatmul.mubr.f32.vlgmr.msra.gmra.mxu0 %v2292_v44  ;;  %275 = vmatprep.subr.mxu0 %v2157_v1 }
  0x40   :  { %276 = vmatpush1.msra.mxu0 %v2159_v2  ;;  %1662 = vmatpush3.msra.mxu1 %v2312_v48 }
  0x41   :  { %277 = vmatprep.subr.mxu0 %v2161_v3  ;;  %1663 = vmatprep.subr.mxu1 %v2937_v0 }
  0x42   :  { %278 = vmatpush1.msra.mxu0 %v2164_v4  ;;  %1664 = vmatpush3.msra.mxu1 %v2318_v49 }
  0x43   :  { %279 = vmatprep.subr.mxu0 %v2167_v5  ;;  %1666 = vmatmul.mubr.f32.vlgmr.msra.gmra.mxu1 %v2292_v44 }
  0x44   :  { %280 = vmatpush1.msra.mxu0 %v2170_v6  ;;  %1668 = vmatprep.subr.mxu1 %v2937_v0 }
  0x45   :  { %281 = vmatprep.subr.mxu0 %v2173_v7  ;;  %1669 = vmatpush3.msra.mxu1 %v2193_v14 }
  0x46   :  { %282 = vmatpush1.msra.mxu0 %v2176_v8  ;;  %1670 = vmatprep.subr.mxu1 %v2937_v0 }
  0x47   :  { %283 = vmatprep.subr.mxu0 %v2179_v9  ;;  %1671 = vmatpush3.msra.mxu1 %v2199_v16 }
  0x48   :  { %284 = vmatpush1.msra.mxu0 %v2182_v10  ;;  %1672 = vmatprep.subr.mxu1 %v2937_v0 }
  0x49   :  { %285 = vmatprep.subr.mxu0 %v2185_v11  ;;  %1673 = vmatpush3.msra.mxu1 %v2205_v18 }
  0x4a   :  { %286 = vmatpush1.msra.mxu0 %v2188_v12  ;;  %1674 = vmatprep.subr.mxu1 %v2937_v0 }
  0x4b   :  { %287 = vmatprep.subr.mxu0 %v2191_v13  ;;  %1675 = vmatpush3.msra.mxu1 %v2215_v21 }
  0x4c   :  { %288 = vmatpush1.msra.mxu0 %v2196_v15  ;;  %1676 = vmatprep.subr.mxu1 %v2937_v0 }
  0x4d   :  { %289 = vmatprep.subr.mxu0 %v2202_v17  ;;  %1677 = vmatpush3.msra.mxu1 %v2225_v24 }
  0x4e   :  { %290 = vmatpush1.msra.mxu0 %v2208_v19  ;;  %1678 = vmatprep.subr.mxu1 %v2937_v0 }
  0x4f   :  { %291 = vmatprep.subr.mxu0 %v2212_v20  ;;  %1679 = vmatpush3.msra.mxu1 %v2235_v27 }
  0x50   :  { %292 = vmatpush1.msra.mxu0 %v2218_v22  ;;  %1680 = vmatprep.subr.mxu1 %v2937_v0 }
  0x51   :  { %293 = vmatprep.subr.mxu0 %v2222_v23  ;;  %1681 = vmatpush3.msra.mxu1 %v2245_v30 }
  0x52   :  { %294 = vmatpush1.msra.mxu0 %v2228_v25  ;;  %1682 = vmatprep.subr.mxu1 %v2937_v0 }
  0x53   :  { %295 = vmatprep.subr.mxu0 %v2232_v26  ;;  %1683 = vmatpush3.msra.mxu1 %v2255_v33 }
  0x54   :  { %296 = vmatpush1.msra.mxu0 %v2238_v28  ;;  %1684 = vmatprep.subr.mxu1 %v2937_v0 }
  0x55   :  { %297 = vmatprep.subr.mxu0 %v2242_v29  ;;  %1685 = vmatpush3.msra.mxu1 %v2265_v36 }
  0x56   :  { %298 = vmatpush1.msra.mxu0 %v2248_v31  ;;  %1686 = vmatprep.subr.mxu1 %v2937_v0 }
  0x57   :  { %299 = vmatprep.subr.mxu0 %v2252_v32  ;;  %1687 = vmatpush3.msra.mxu1 %v2275_v39 }
  0x58   :  { %300 = vmatpush1.msra.mxu0 %v2258_v34  ;;  %1688 = vmatprep.subr.mxu1 %v2937_v0 }
  0x59   :  { %301 = vmatprep.subr.mxu0 %v2262_v35  ;;  %1689 = vmatpush3.msra.mxu1 %v2285_v42 }
  0x5a   :  { %302 = vmatpush1.msra.mxu0 %v2268_v37  ;;  %1690 = vmatprep.subr.mxu1 %v2937_v0 }
  0x5b   :  { %303 = vmatprep.subr.mxu0 %v2272_v38  ;;  %1691 = vmatpush3.msra.mxu1 %v2295_v45 }
  0x5c   :  { %304 = vmatpush1.msra.mxu0 %v2278_v40  ;;  %1692 = vmatprep.subr.mxu1 %v2937_v0 }
  0x5d   :  { %305 = vmatprep.subr.mxu0 %v2282_v41  ;;  %1693 = vmatpush3.msra.mxu1 %v2301_v46 }
  0x5e   :  { %306 = vmatpush1.msra.mxu0 %v2288_v43  ;;  %339 = vmatprep.mubr.f32.mxu0 %v2937_v0 }
  0x5f   :  { %1694 = vmatprep.subr.mxu1 %v2937_v0  ;;  %1700 = vmatprep.mubr.msk.f32.mxu1 %vm2124_vm0, %v2937_v0 }
  0x60   :  { %1695 = vmatpush3.msra.mxu1 %v2306_v47  ;;  %445 = vmatprep.subr.mxu0 %v2157_v1 }
  0x61   :  { %1696 = vmatprep.subr.mxu1 %v2937_v0 }
  0x62   :  { %1697 = vmatpush3.msra.mxu1 %v2312_v48 }
  0x63   :  { %1698 = vmatprep.subr.mxu1 %v2937_v0 }
  0x64   :  { %1699 = vmatpush3.msra.mxu1 %v2318_v49 }
  0x65   :  { %1703 = vmatprep.subr.mxu1 %v2937_v0 }
  0xff   :  { %v171_v51 = vpop.f32.mrf.mxu0 }
 0x100   :  { %v246_v52 = vadd.f32 %v171_v51, %v56_v50 }
 0x101   :  { %v173_v55 = vpop.f32.mrf.mxu0 }
 0x102   :  { %v1481_v53 = vmul.f32 -1.442695, %v246_v52  ;;  %v256_v56 = vadd.f32 %v254_v54, %v173_v55  ;;  %v265_v52 = vrot.slane %v56_v50, 4 }
 0x103   :  { %v242_v57 = vpop.f32.mrf.mxu1 }
 0x104   :  { %1922 = vpow2.f32 %v1481_v53  ;;  %v1482_v58 = vmul.f32 -1.442695, %v256_v56  ;;  %v263_v51 = vadd.f32 %v2392_v63, %v242_v57 }
 0x105   :  { %v1667_v59 = vpop.f32.mrf.mxu1 }
 0x106   :  { %1924 = vpow2.f32 %v1482_v58 }
 0x111   :  { %v1923_v60 = vpop.eup %1922 }
 0x112   :  { %v250_v61 = vadd.f32 1.0, %v1923_v60 }
 0x113   :  { %v1925_v62 = vpop.eup %1924 }
 0x114   :  { %1926 = vrcp.f32 %v250_v61  ;;  %v260_v0 = vadd.f32 1.0, %v1925_v62 }
 0x116   :  { %1928 = vrcp.f32 %v260_v0  ;;  %v2962_v0 = vmov 0.0  }
 0x121   :  { %v1927_v1 = vpop.eup %1926 }
 0x122   :  { %v264_v53 = vmul.f32 %v1927_v1, %v263_v51  ;;  %v2963_v1 = vld [vmem:[#allocation11_spill] sm:$0xff] }
 0x123   :  { %v1929_v55 = vpop.eup %1928 }
 0x124   :  { %v267_v54 = vadd.f32 %v265_v52, %v264_v53  ;;  %v269_v56 = vsub.f32 1.0, %v1929_v55  ;;  %v271_v60 = vmul.f32 %v1929_v55, %v2292_v44  ;;  %v274_v44 = vld [vmem:[#allocation2 + $0x6] sm:$0x3f] }
 0x125   :  { %v424_v53 = vrot.slane %v274_v44, 2 }
 0x126   :  { %1930 = vtanh.f32 %v267_v54 }
 0x133   :  { %v1931_v58 = vpop.eup %1930 }
 0x134   :  { %v270_v59 = vmul.f32 %v1931_v58, %v269_v56 }
 0x136   :  { %v2396_v61 = vadd.f32 %v271_v60, %v270_v59 }
 0x138   :  { %340 = vmatmul.mubr.f32.vlgmr.msra.gmra.mxu0 %v2396_v61  ;;  %1701 = vmatmul.mubr.f32.vlgmr.msra.gmra.mxu1 %v2396_v61 }
 0x139   :  { %446 = vmatpush1.msra.mxu0 %v2159_v2  ;;  %1704 = vmatpush3.msra.mxu1 %v2193_v14 }
 0x13a   :  { %447 = vmatprep.subr.mxu0 %v2161_v3  ;;  %1705 = vmatprep.subr.mxu1 %v2962_v0 }
 0x13b   :  { %448 = vmatpush1.msra.mxu0 %v2164_v4  ;;  %1706 = vmatpush3.msra.mxu1 %v2199_v16 }
 0x13c   :  { %449 = vmatprep.subr.mxu0 %v2167_v5  ;;  %1707 = vmatprep.subr.mxu1 %v2962_v0 }
 0x13d   :  { %450 = vmatpush1.msra.mxu0 %v2170_v6  ;;  %1708 = vmatpush3.msra.mxu1 %v2205_v18 }
 0x13e   :  { %451 = vmatprep.subr.mxu0 %v2173_v7  ;;  %1709 = vmatprep.subr.mxu1 %v2962_v0 }
 0x13f   :  { %452 = vmatpush1.msra.mxu0 %v2176_v8  ;;  %1710 = vmatpush3.msra.mxu1 %v2215_v21 }
 0x140   :  { %453 = vmatprep.subr.mxu0 %v2179_v9  ;;  %1711 = vmatprep.subr.mxu1 %v2962_v0 }
 0x141   :  { %454 = vmatpush1.msra.mxu0 %v2182_v10  ;;  %1712 = vmatpush3.msra.mxu1 %v2225_v24 }
 0x142   :  { %455 = vmatprep.subr.mxu0 %v2185_v11  ;;  %1713 = vmatprep.subr.mxu1 %v2962_v0 }
 0x143   :  { %456 = vmatpush1.msra.mxu0 %v2188_v12  ;;  %1714 = vmatpush3.msra.mxu1 %v2235_v27 }
 0x144   :  { %457 = vmatprep.subr.mxu0 %v2191_v13  ;;  %1715 = vmatprep.subr.mxu1 %v2962_v0 }
 0x145   :  { %458 = vmatpush1.msra.mxu0 %v2196_v15  ;;  %1716 = vmatpush3.msra.mxu1 %v2245_v30 }
 0x146   :  { %459 = vmatprep.subr.mxu0 %v2202_v17  ;;  %1717 = vmatprep.subr.mxu1 %v2962_v0 }
 0x147   :  { %460 = vmatpush1.msra.mxu0 %v2208_v19  ;;  %1718 = vmatpush3.msra.mxu1 %v2255_v33 }
 0x148   :  { %461 = vmatprep.subr.mxu0 %v2212_v20  ;;  %1719 = vmatprep.subr.mxu1 %v2962_v0 }
 0x149   :  { %462 = vmatpush1.msra.mxu0 %v2218_v22  ;;  %1720 = vmatpush3.msra.mxu1 %v2265_v36 }
 0x14a   :  { %463 = vmatprep.subr.mxu0 %v2222_v23  ;;  %1721 = vmatprep.subr.mxu1 %v2962_v0 }
 0x14b   :  { %464 = vmatpush1.msra.mxu0 %v2228_v25  ;;  %1722 = vmatpush3.msra.mxu1 %v2275_v39 }
 0x14c   :  { %465 = vmatprep.subr.mxu0 %v2232_v26  ;;  %1723 = vmatprep.subr.mxu1 %v2962_v0 }
 0x14d   :  { %466 = vmatpush1.msra.mxu0 %v2238_v28  ;;  %1724 = vmatpush3.msra.mxu1 %v2285_v42 }
 0x14e   :  { %467 = vmatprep.subr.mxu0 %v2242_v29  ;;  %1725 = vmatprep.subr.mxu1 %v2962_v0 }
 0x14f   :  { %468 = vmatpush1.msra.mxu0 %v2248_v31  ;;  %1726 = vmatpush3.msra.mxu1 %v2295_v45 }
 0x150   :  { %469 = vmatprep.subr.mxu0 %v2252_v32  ;;  %1727 = vmatprep.subr.mxu1 %v2962_v0 }
 0x151   :  { %470 = vmatpush1.msra.mxu0 %v2258_v34  ;;  %1728 = vmatpush3.msra.mxu1 %v2301_v46 }
 0x152   :  { %471 = vmatprep.subr.mxu0 %v2262_v35  ;;  %1729 = vmatprep.subr.mxu1 %v2962_v0 }
 0x153   :  { %472 = vmatpush1.msra.mxu0 %v2268_v37  ;;  %1730 = vmatpush3.msra.mxu1 %v2306_v47 }
 0x154   :  { %473 = vmatprep.subr.mxu0 %v2272_v38  ;;  %1731 = vmatprep.subr.mxu1 %v2962_v0 }
 0x155   :  { %474 = vmatpush1.msra.mxu0 %v2278_v40  ;;  %1732 = vmatpush3.msra.mxu1 %v2312_v48 }
 0x156   :  { %475 = vmatprep.subr.mxu0 %v2282_v41  ;;  %1733 = vmatprep.subr.mxu1 %v2962_v0 }
 0x157   :  { %476 = vmatpush1.msra.mxu0 %v2288_v43  ;;  %509 = vmatprep.mubr.f32.mxu0 %v2962_v0 }
 0x158   :  { %1734 = vmatpush3.msra.mxu1 %v2318_v49  ;;  %1735 = vmatprep.mubr.msk.f32.mxu1 %vm2124_vm0, %v2962_v0 }
 0x159   :  { %615 = vmatprep.subr.mxu0 %v2963_v1  ;;  %1738 = vmatprep.subr.mxu1 %v2962_v0  ;;  %v435_v1 = vrot.slane %v274_v44, 4 }
 0x1f8   :  { %v341_v50 = vpop.f32.mrf.mxu0  ;;  %v412_v57 = vpop.f32.mrf.mxu1 }
 0x1f9   :  { %v416_v62 = vadd.f32 %v341_v50, %v274_v44  ;;  %v433_v43 = vadd.f32 %v2392_v63, %v412_v57 }
 0x1fa   :  { %v1702_v51 = vpop.f32.mrf.mxu1  ;;  %v343_v54 = vpop.f32.mrf.mxu0 }
 0x1fb   :  { %v1483_v52 = vmul.f32 -1.442695, %v416_v62  ;;  %v426_v55 = vadd.f32 %v424_v53, %v343_v54 }
 0x1fd   :  { %1932 = vpow2.f32 %v1483_v52  ;;  %v1484_v56 = vmul.f32 -1.442695, %v426_v55 }
 0x1ff   :  { %1934 = vpow2.f32 %v1484_v56 }
 0x20a   :  { %v1933_v58 = vpop.eup %1932 }
 0x20b   :  { %v420_v59 = vadd.f32 1.0, %v1933_v58 }
 0x20c   :  { %v1935_v60 = vpop.eup %1934 }
 0x20d   :  { %1936 = vrcp.f32 %v420_v59  ;;  %v430_v49 = vadd.f32 1.0, %v1935_v60 }
 0x20f   :  { %1938 = vrcp.f32 %v430_v49  ;;  %v2968_v49 = vld [vmem:[#allocation16_spill] sm:$0xff] }
 0x21a   :  { %v1937_v41 = vpop.eup %1936 }
 0x21b   :  { %v434_v48 = vmul.f32 %v1937_v41, %v433_v43  ;;  %v2965_v41 = vld [vmem:[#allocation15_spill] sm:$0xff]  ;;  %v2966_v43 = vld [vmem:[#allocation13_spill] sm:$0xff] }
 0x21c   :  { %v1939_v62 = vpop.eup %1938 }
 0x21d   :  { %v437_v50 = vadd.f32 %v435_v1, %v434_v48  ;;  %v439_v51 = vsub.f32 1.0, %v1939_v62  ;;  %v441_v53 = vmul.f32 %v1939_v62, %v2396_v61  ;;  %v2967_v48 = vld [vmem:[#allocation14_spill] sm:$0xff]  ;;  %v2969_v61 = vld [vmem:[#allocation11_spill] sm:$0xff] }
 0x21e   :  { %v444_v1 = vld [vmem:[#allocation2 + $0xc] sm:$0x3f] }
 0x21f   :  { %1940 = vtanh.f32 %v437_v50  ;;  %v594_v59 = vrot.slane %v444_v1, 2 }
 0x22c   :  { %v1941_v40 = vpop.eup %1940 }
 0x22d   :  { %v440_v52 = vmul.f32 %v1941_v40, %v439_v51  ;;  %v2964_v40 = vld [vmem:[#allocation12_spill] sm:$0xff] }
 0x22f   :  { %v2469_v54 = vadd.f32 %v441_v53, %v440_v52 }
 0x231   :  { %510 = vmatmul.mubr.f32.vlgmr.msra.gmra.mxu0 %v2469_v54  ;;  %1736 = vmatmul.mubr.f32.vlgmr.msra.gmra.mxu1 %v2469_v54 }
 0x232   :  { %616 = vmatpush1.msra.mxu0 %v2159_v2  ;;  %1739 = vmatpush3.msra.mxu1 %v2193_v14 }
 0x233   :  { %617 = vmatprep.subr.mxu0 %v2161_v3  ;;  %1740 = vmatprep.subr.mxu1 %v2962_v0 }
 0x234   :  { %618 = vmatpush1.msra.mxu0 %v2164_v4  ;;  %1741 = vmatpush3.msra.mxu1 %v2199_v16 }
 0x235   :  { %619 = vmatprep.subr.mxu0 %v2167_v5  ;;  %1742 = vmatprep.subr.mxu1 %v2962_v0 }
 0x236   :  { %620 = vmatpush1.msra.mxu0 %v2170_v6  ;;  %1743 = vmatpush3.msra.mxu1 %v2205_v18 }
 0x237   :  { %621 = vmatprep.subr.mxu0 %v2173_v7  ;;  %1744 = vmatprep.subr.mxu1 %v2962_v0 }
 0x238   :  { %622 = vmatpush1.msra.mxu0 %v2176_v8  ;;  %1745 = vmatpush3.msra.mxu1 %v2215_v21 }
 0x239   :  { %623 = vmatprep.subr.mxu0 %v2179_v9  ;;  %1746 = vmatprep.subr.mxu1 %v2962_v0 }
 0x23a   :  { %624 = vmatpush1.msra.mxu0 %v2182_v10  ;;  %1747 = vmatpush3.msra.mxu1 %v2225_v24 }
 0x23b   :  { %625 = vmatprep.subr.mxu0 %v2185_v11  ;;  %1748 = vmatprep.subr.mxu1 %v2962_v0 }
 0x23c   :  { %626 = vmatpush1.msra.mxu0 %v2188_v12  ;;  %1749 = vmatpush3.msra.mxu1 %v2235_v27 }
 0x23d   :  { %627 = vmatprep.subr.mxu0 %v2191_v13  ;;  %1750 = vmatprep.subr.mxu1 %v2962_v0 }
 0x23e   :  { %628 = vmatpush1.msra.mxu0 %v2196_v15  ;;  %1751 = vmatpush3.msra.mxu1 %v2245_v30 }
 0x23f   :  { %629 = vmatprep.subr.mxu0 %v2202_v17  ;;  %1752 = vmatprep.subr.mxu1 %v2962_v0 }
 0x240   :  { %630 = vmatpush1.msra.mxu0 %v2208_v19  ;;  %1753 = vmatpush3.msra.mxu1 %v2255_v33 }
 0x241   :  { %631 = vmatprep.subr.mxu0 %v2212_v20  ;;  %1754 = vmatprep.subr.mxu1 %v2962_v0 }
 0x242   :  { %632 = vmatpush1.msra.mxu0 %v2218_v22  ;;  %1755 = vmatpush3.msra.mxu1 %v2265_v36 }
 0x243   :  { %633 = vmatprep.subr.mxu0 %v2222_v23  ;;  %1756 = vmatprep.subr.mxu1 %v2962_v0 }
 0x244   :  { %634 = vmatpush1.msra.mxu0 %v2228_v25  ;;  %1757 = vmatpush3.msra.mxu1 %v2275_v39 }
 0x245   :  { %635 = vmatprep.subr.mxu0 %v2232_v26  ;;  %1758 = vmatprep.subr.mxu1 %v2962_v0 }
 0x246   :  { %636 = vmatpush1.msra.mxu0 %v2238_v28  ;;  %1759 = vmatpush3.msra.mxu1 %v2285_v42 }
 0x247   :  { %637 = vmatprep.subr.mxu0 %v2242_v29  ;;  %1760 = vmatprep.subr.mxu1 %v2962_v0 }
 0x248   :  { %638 = vmatpush1.msra.mxu0 %v2248_v31  ;;  %1761 = vmatpush3.msra.mxu1 %v2295_v45 }
 0x249   :  { %639 = vmatprep.subr.mxu0 %v2252_v32  ;;  %1762 = vmatprep.subr.mxu1 %v2962_v0 }
 0x24a   :  { %640 = vmatpush1.msra.mxu0 %v2258_v34  ;;  %1763 = vmatpush3.msra.mxu1 %v2301_v46 }
 0x24b   :  { %641 = vmatprep.subr.mxu0 %v2262_v35  ;;  %1764 = vmatprep.subr.mxu1 %v2962_v0 }
 0x24c   :  { %642 = vmatpush1.msra.mxu0 %v2268_v37  ;;  %1765 = vmatpush3.msra.mxu1 %v2306_v47 }
 0x24d   :  { %643 = vmatprep.subr.mxu0 %v2272_v38  ;;  %1766 = vmatprep.subr.mxu1 %v2962_v0 }
 0x24e   :  { %644 = vmatpush1.msra.mxu0 %v2964_v40  ;;  %1767 = vmatpush3.msra.mxu1 %v2965_v41 }
 0x24f   :  { %645 = vmatprep.subr.mxu0 %v2966_v43  ;;  %1768 = vmatprep.subr.mxu1 %v2962_v0 }
 0x250   :  { %646 = vmatpush1.msra.mxu0 %v2967_v48  ;;  %679 = vmatprep.mubr.f32.mxu0 %v2962_v0 }
 0x251   :  { %1769 = vmatpush3.msra.mxu1 %v2968_v49  ;;  %1770 = vmatprep.mubr.msk.f32.mxu1 %vm2124_vm0, %v2962_v0 }
 0x252   :  { %785 = vmatprep.subr.mxu0 %v2969_v61  ;;  %1773 = vmatprep.subr.mxu1 %v2962_v0  ;;  %v605_v61 = vrot.slane %v444_v1, 4 }
 0x2f1   :  { %v511_v44 = vpop.f32.mrf.mxu0  ;;  %v582_v57 = vpop.f32.mrf.mxu1 }
 0x2f2   :  { %v586_v55 = vadd.f32 %v511_v44, %v444_v1  ;;  %v603_v48 = vadd.f32 %v2392_v63, %v582_v57 }
 0x2f3   :  { %v1737_v56 = vpop.f32.mrf.mxu1  ;;  %v513_v60 = vpop.f32.mrf.mxu0 }
 0x2f4   :  { %v1485_v58 = vmul.f32 -1.442695, %v586_v55  ;;  %v596_v50 = vadd.f32 %v594_v59, %v513_v60 }
 0x2f6   :  { %1942 = vpow2.f32 %v1485_v58  ;;  %v1486_v62 = vmul.f32 -1.442695, %v596_v50 }
 0x2f8   :  { %1944 = vpow2.f32 %v1486_v62 }
 0x303   :  { %v1943_v51 = vpop.eup %1942 }
 0x304   :  { %v590_v52 = vadd.f32 1.0, %v1943_v51 }
 0x305   :  { %v1945_v53 = vpop.eup %1944 }
 0x306   :  { %1946 = vrcp.f32 %v590_v52  ;;  %v600_v49 = vadd.f32 1.0, %v1945_v53 }
 0x308   :  { %1948 = vrcp.f32 %v600_v49  ;;  %v2975_v49 = vld [vmem:[#allocation11_spill] sm:$0xff] }
 0x313   :  { %v1947_v43 = vpop.eup %1946 }
 0x314   :  { %v604_v41 = vmul.f32 %v1947_v43, %v603_v48  ;;  %v2973_v43 = vld [vmem:[#allocation14_spill] sm:$0xff]  ;;  %v2974_v48 = vld [vmem:[#allocation16_spill] sm:$0xff] }
 0x315   :  { %v1949_v55 = vpop.eup %1948 }
 0x316   :  { %v607_v44 = vadd.f32 %v605_v61, %v604_v41  ;;  %v609_v56 = vsub.f32 1.0, %v1949_v55  ;;  %v611_v59 = vmul.f32 %v1949_v55, %v2469_v54  ;;  %v2970_v54 = vld [vmem:[#allocation12_spill] sm:$0xff]  ;;  %v2972_v41 = vld [vmem:[#allocation13_spill] sm:$0xff]  ;;  %v614_v61 = vld [vmem:[#allocation2 + $0x12] sm:$0x3f] }
 0x317   :  { %v764_v52 = vrot.slane %v614_v61, 2 }
 0x318   :  { %1950 = vtanh.f32 %v607_v44 }
 0x325   :  { %v1951_v40 = vpop.eup %1950 }
 0x326   :  { %v610_v58 = vmul.f32 %v1951_v40, %v609_v56  ;;  %v2971_v40 = vld [vmem:[#allocation15_spill] sm:$0xff] }
 0x328   :  { %v2542_v60 = vadd.f32 %v611_v59, %v610_v58 }
 0x32a   :  { %680 = vmatmul.mubr.f32.vlgmr.msra.gmra.mxu0 %v2542_v60  ;;  %1771 = vmatmul.mubr.f32.vlgmr.msra.gmra.mxu1 %v2542_v60 }
 0x32b   :  { %786 = vmatpush1.msra.mxu0 %v2159_v2  ;;  %1774 = vmatpush3.msra.mxu1 %v2193_v14 }
 0x32c   :  { %787 = vmatprep.subr.mxu0 %v2161_v3  ;;  %1775 = vmatprep.subr.mxu1 %v2962_v0 }
 0x32d   :  { %788 = vmatpush1.msra.mxu0 %v2164_v4  ;;  %1776 = vmatpush3.msra.mxu1 %v2199_v16 }
 0x32e   :  { %789 = vmatprep.subr.mxu0 %v2167_v5  ;;  %1777 = vmatprep.subr.mxu1 %v2962_v0 }
 0x32f   :  { %790 = vmatpush1.msra.mxu0 %v2170_v6  ;;  %1778 = vmatpush3.msra.mxu1 %v2205_v18 }
 0x330   :  { %791 = vmatprep.subr.mxu0 %v2173_v7  ;;  %1779 = vmatprep.subr.mxu1 %v2962_v0 }
 0x331   :  { %792 = vmatpush1.msra.mxu0 %v2176_v8  ;;  %1780 = vmatpush3.msra.mxu1 %v2215_v21 }
 0x332   :  { %793 = vmatprep.subr.mxu0 %v2179_v9  ;;  %1781 = vmatprep.subr.mxu1 %v2962_v0 }
 0x333   :  { %794 = vmatpush1.msra.mxu0 %v2182_v10  ;;  %1782 = vmatpush3.msra.mxu1 %v2225_v24 }
 0x334   :  { %795 = vmatprep.subr.mxu0 %v2185_v11  ;;  %1783 = vmatprep.subr.mxu1 %v2962_v0 }
 0x335   :  { %796 = vmatpush1.msra.mxu0 %v2188_v12  ;;  %1784 = vmatpush3.msra.mxu1 %v2235_v27 }
 0x336   :  { %797 = vmatprep.subr.mxu0 %v2191_v13  ;;  %1785 = vmatprep.subr.mxu1 %v2962_v0 }
 0x337   :  { %798 = vmatpush1.msra.mxu0 %v2196_v15  ;;  %1786 = vmatpush3.msra.mxu1 %v2245_v30 }
 0x338   :  { %799 = vmatprep.subr.mxu0 %v2202_v17  ;;  %1787 = vmatprep.subr.mxu1 %v2962_v0 }
 0x339   :  { %800 = vmatpush1.msra.mxu0 %v2208_v19  ;;  %1788 = vmatpush3.msra.mxu1 %v2255_v33 }
 0x33a   :  { %801 = vmatprep.subr.mxu0 %v2212_v20  ;;  %1789 = vmatprep.subr.mxu1 %v2962_v0 }
 0x33b   :  { %802 = vmatpush1.msra.mxu0 %v2218_v22  ;;  %1790 = vmatpush3.msra.mxu1 %v2265_v36 }
 0x33c   :  { %803 = vmatprep.subr.mxu0 %v2222_v23  ;;  %1791 = vmatprep.subr.mxu1 %v2962_v0 }
 0x33d   :  { %804 = vmatpush1.msra.mxu0 %v2228_v25  ;;  %1792 = vmatpush3.msra.mxu1 %v2275_v39 }
 0x33e   :  { %805 = vmatprep.subr.mxu0 %v2232_v26  ;;  %1793 = vmatprep.subr.mxu1 %v2962_v0 }
 0x33f   :  { %806 = vmatpush1.msra.mxu0 %v2238_v28  ;;  %1794 = vmatpush3.msra.mxu1 %v2285_v42 }
 0x340   :  { %807 = vmatprep.subr.mxu0 %v2242_v29  ;;  %1795 = vmatprep.subr.mxu1 %v2962_v0 }
 0x341   :  { %808 = vmatpush1.msra.mxu0 %v2248_v31  ;;  %1796 = vmatpush3.msra.mxu1 %v2295_v45 }
 0x342   :  { %809 = vmatprep.subr.mxu0 %v2252_v32  ;;  %1797 = vmatprep.subr.mxu1 %v2962_v0 }
 0x343   :  { %810 = vmatpush1.msra.mxu0 %v2258_v34  ;;  %1798 = vmatpush3.msra.mxu1 %v2301_v46 }
 0x344   :  { %811 = vmatprep.subr.mxu0 %v2262_v35  ;;  %1799 = vmatprep.subr.mxu1 %v2962_v0 }
 0x345   :  { %812 = vmatpush1.msra.mxu0 %v2268_v37  ;;  %1800 = vmatpush3.msra.mxu1 %v2306_v47 }
 0x346   :  { %813 = vmatprep.subr.mxu0 %v2272_v38  ;;  %1801 = vmatprep.subr.mxu1 %v2962_v0 }
 0x347   :  { %814 = vmatpush1.msra.mxu0 %v2970_v54  ;;  %1802 = vmatpush3.msra.mxu1 %v2971_v40 }
 0x348   :  { %815 = vmatprep.subr.mxu0 %v2972_v41  ;;  %1803 = vmatprep.subr.mxu1 %v2962_v0 }
 0x349   :  { %816 = vmatpush1.msra.mxu0 %v2973_v43  ;;  %849 = vmatprep.mubr.f32.mxu0 %v2962_v0 }
 0x34a   :  { %1804 = vmatpush3.msra.mxu1 %v2974_v48  ;;  %1805 = vmatprep.mubr.msk.f32.mxu1 %vm2124_vm0, %v2962_v0 }
 0x34b   :  { %955 = vmatprep.subr.mxu0 %v2975_v49  ;;  %1808 = vmatprep.subr.mxu1 %v2962_v0  ;;  %v775_v49 = vrot.slane %v614_v61, 4 }
 0x3ea   :  { %v681_v1 = vpop.f32.mrf.mxu0  ;;  %v752_v57 = vpop.f32.mrf.mxu1 }
 0x3eb   :  { %v756_v50 = vadd.f32 %v681_v1, %v614_v61  ;;  %v773_v43 = vadd.f32 %v2392_v63, %v752_v57  ;;  %v2750_v61 = vld [vmem:[#allocation5 + $0xe0] sm:$0xff]  ;;  %v2754_v57 = vld [vmem:[#allocation5 + $0xd8] sm:$0xff] }
 0x3ec   :  { %v1772_v62 = vpop.f32.mrf.mxu1  ;;  %v683_v53 = vpop.f32.mrf.mxu0 }
 0x3ed   :  { %v1487_v51 = vmul.f32 -1.442695, %v756_v50  ;;  %v766_v44 = vadd.f32 %v764_v52, %v683_v53 }
 0x3ef   :  { %1952 = vpow2.f32 %v1487_v51  ;;  %v1488_v55 = vmul.f32 -1.442695, %v766_v44  ;;  %v2757_v44 = vld [vmem:[#allocation5 + $0xe8] sm:$0xff] }
 0x3f1   :  { %1954 = vpow2.f32 %v1488_v55  ;;  %v2760_v55 = vld [vmem:[#allocation5 + $0xc8] sm:$0xff] }
 0x3fc   :  { %v1953_v56 = vpop.eup %1952 }
 0x3fd   :  { %v760_v58 = vadd.f32 1.0, %v1953_v56  ;;  %v2764_v56 = vld [vmem:[#allocation5 + $0xc0] sm:$0xff] }
 0x3fe   :  { %v1955_v59 = vpop.eup %1954 }
 0x3ff   :  { %1956 = vrcp.f32 %v760_v58  ;;  %v770_v48 = vadd.f32 1.0, %v1955_v59  ;;  %v2767_v58 = vld [vmem:[#allocation5 + $0xd0] sm:$0xff] }
 0x400   :  { %v2770_v59 = vld [vmem:[#allocation5 + $0xb0] sm:$0xff] }
 0x401   :  { %1958 = vrcp.f32 %v770_v48  ;;  %v2747_v48 = vld [vmem:[#allocation5 + $0x100] sm:$0xff] }
 0x40c   :  { %v1957_v41 = vpop.eup %1956 }
 0x40d   :  { %v774_v40 = vmul.f32 %v1957_v41, %v773_v43  ;;  %v2740_v41 = vld [vmem:[#allocation5 + $0xf8] sm:$0xff]  ;;  %v2744_v43 = vld [vmem:[#allocation5 + $0xf0] sm:$0xff] }
 0x40e   :  { %v1959_v50 = vpop.eup %1958 }
 0x40f   :  { %v777_v1 = vadd.f32 %v775_v49, %v774_v40  ;;  %v779_v62 = vsub.f32 1.0, %v1959_v50  ;;  %v781_v52 = vmul.f32 %v1959_v50, %v2542_v60  ;;  %v2730_v60 = vld [vmem:[#allocation5 + $0x110] sm:$0xff]  ;;  %v2737_v40 = vld [vmem:[#allocation5 + $0x118] sm:$0xff]  ;;  %v2774_v49 = vld [vmem:[#allocation5 + $0xa8] sm:$0xff] }
 0x410   :  { %v2780_v50 = vld [vmem:[#allocation5 + $0x98] sm:$0xff] }
 0x411   :  { %1960 = vtanh.f32 %v777_v1  ;;  %v2777_v1 = vld [vmem:[#allocation5 + $0xb8] sm:$0xff] }
 0x41e   :  { %v1961_v54 = vpop.eup %1960 }
 0x41f   :  { %v780_v51 = vmul.f32 %v1961_v54, %v779_v62  ;;  %v2734_v54 = vld [vmem:[#allocation5 + $0x108] sm:$0xff]  ;;  %v2784_v62 = vld [vmem:[#allocation5 + $0x90] sm:$0xff] }
 0x421   :  { %v2615_v53 = vadd.f32 %v781_v52, %v780_v51  ;;  %v2787_v51 = vld [vmem:[#allocation5 + $0xa0] sm:$0xff] }
 0x422   :  { %v2790_v52 = vld [vmem:[#allocation5 + $0x80] sm:$0xff] }
 0x423   :  { %850 = vmatmul.mubr.f32.vlgmr.msra.gmra.mxu0 %v2615_v53  ;;  %1806 = vmatmul.mubr.f32.vlgmr.msra.gmra.mxu1 %v2615_v53 }
 0x424   :  { %956 = vmatpush1.msra.mxu0 %v2159_v2  ;;  %1809 = vmatpush3.msra.mxu1 %v2193_v14  ;;  %v2976_v2 = vld [vmem:[#allocation12_spill] sm:$0xff] }
 0x425   :  { %957 = vmatprep.subr.mxu0 %v2161_v3  ;;  %1810 = vmatprep.subr.mxu1 %v2962_v0  ;;  %v2977_v3 = vld [vmem:[#allocation15_spill] sm:$0xff] }
 0x426   :  { %958 = vmatpush1.msra.mxu0 %v2164_v4  ;;  %1811 = vmatpush3.msra.mxu1 %v2199_v16  ;;  %v2978_v4 = vld [vmem:[#allocation13_spill] sm:$0xff] }
 0x427   :  { %959 = vmatprep.subr.mxu0 %v2167_v5  ;;  %1812 = vmatprep.subr.mxu1 %v2962_v0  ;;  %v2979_v5 = vld [vmem:[#allocation14_spill] sm:$0xff] }
 0x428   :  { %960 = vmatpush1.msra.mxu0 %v2170_v6  ;;  %1813 = vmatpush3.msra.mxu1 %v2205_v18  ;;  %v2980_v6 = vld [vmem:[#allocation16_spill] sm:$0xff] }
 0x429   :  { %961 = vmatprep.subr.mxu0 %v2173_v7  ;;  %1814 = vmatprep.subr.mxu1 %v2962_v0  ;;  %v2684_v7 = vld [vmem:[#allocation5 + $0x170] sm:$0xff] }
 0x42a   :  { %962 = vmatpush1.msra.mxu0 %v2176_v8  ;;  %1815 = vmatpush3.msra.mxu1 %v2215_v21  ;;  %v784_v8 = vld [vmem:[#allocation2 + $0x18] sm:$0x3f] }
 0x42b   :  { %963 = vmatprep.subr.mxu0 %v2179_v9  ;;  %1816 = vmatprep.subr.mxu1 %v2962_v0  ;;  %v934_v14 = vrot.slane %v784_v8, 2 }
 0x42c   :  { %964 = vmatpush1.msra.mxu0 %v2182_v10  ;;  %1817 = vmatpush3.msra.mxu1 %v2225_v24 }
 0x42d   :  { %965 = vmatprep.subr.mxu0 %v2185_v11  ;;  %1818 = vmatprep.subr.mxu1 %v2962_v0 }
 0x42e   :  { %966 = vmatpush1.msra.mxu0 %v2188_v12  ;;  %1819 = vmatpush3.msra.mxu1 %v2235_v27 }
 0x42f   :  { %967 = vmatprep.subr.mxu0 %v2191_v13  ;;  %1820 = vmatprep.subr.mxu1 %v2962_v0 }
 0x430   :  { %968 = vmatpush1.msra.mxu0 %v2196_v15  ;;  %1821 = vmatpush3.msra.mxu1 %v2245_v30 }
 0x431   :  { %969 = vmatprep.subr.mxu0 %v2202_v17  ;;  %1822 = vmatprep.subr.mxu1 %v2962_v0 }
 0x432   :  { %970 = vmatpush1.msra.mxu0 %v2208_v19  ;;  %1823 = vmatpush3.msra.mxu1 %v2255_v33  ;;  %v2694_v33 = vld [vmem:[#allocation5 + $0x168] sm:$0xff] }
 0x433   :  { %971 = vmatprep.subr.mxu0 %v2212_v20  ;;  %1824 = vmatprep.subr.mxu1 %v2962_v0 }
 0x434   :  { %972 = vmatpush1.msra.mxu0 %v2218_v22  ;;  %1825 = vmatpush3.msra.mxu1 %v2265_v36  ;;  %v945_v22 = vrot.slane %v784_v8, 4  ;;  %v2704_v36 = vld [vmem:[#allocation5 + $0x150] sm:$0xff] }
 0x435   :  { %973 = vmatprep.subr.mxu0 %v2222_v23  ;;  %1826 = vmatprep.subr.mxu1 %v2962_v0 }
 0x436   :  { %974 = vmatpush1.msra.mxu0 %v2228_v25  ;;  %1827 = vmatpush3.msra.mxu1 %v2275_v39  ;;  %v2714_v39 = vld [vmem:[#allocation5 + $0x138] sm:$0xff] }
 0x437   :  { %975 = vmatprep.subr.mxu0 %v2232_v26  ;;  %1828 = vmatprep.subr.mxu1 %v2962_v0 }
 0x438   :  { %976 = vmatpush1.msra.mxu0 %v2238_v28  ;;  %1829 = vmatpush3.msra.mxu1 %v2285_v42  ;;  %v2717_v42 = vld [vmem:[#allocation5 + $0x148] sm:$0xff] }
 0x439   :  { %977 = vmatprep.subr.mxu0 %v2242_v29  ;;  %1830 = vmatprep.subr.mxu1 %v2962_v0 }
 0x43a   :  { %978 = vmatpush1.msra.mxu0 %v2248_v31  ;;  %1831 = vmatpush3.msra.mxu1 %v2295_v45  ;;  %v2720_v45 = vld [vmem:[#allocation5 + $0x128] sm:$0xff] }
 0x43b   :  { %979 = vmatprep.subr.mxu0 %v2252_v32  ;;  %1832 = vmatprep.subr.mxu1 %v2962_v0 }
 0x43c   :  { %980 = vmatpush1.msra.mxu0 %v2258_v34  ;;  %1833 = vmatpush3.msra.mxu1 %v2301_v46  ;;  %v2697_v34 = vld [vmem:[#allocation5 + $0x178] sm:$0xff]  ;;  %v2724_v46 = vld [vmem:[#allocation5 + $0x120] sm:$0xff] }
 0x43d   :  { %981 = vmatprep.subr.mxu0 %v2262_v35  ;;  %1834 = vmatprep.subr.mxu1 %v2962_v0  ;;  %v2700_v35 = vld [vmem:[#allocation5 + $0x158] sm:$0xff] }
 0x43e   :  { %982 = vmatpush1.msra.mxu0 %v2268_v37  ;;  %1835 = vmatpush3.msra.mxu1 %v2306_v47  ;;  %v2707_v37 = vld [vmem:[#allocation5 + $0x160] sm:$0xff]  ;;  %v2727_v47 = vld [vmem:[#allocation5 + $0x130] sm:$0xff] }
 0x43f   :  { %983 = vmatprep.subr.mxu0 %v2272_v38  ;;  %1836 = vmatprep.subr.mxu1 %v2962_v0  ;;  %v2710_v38 = vld [vmem:[#allocation5 + $0x140] sm:$0xff] }
 0x440   :  { %984 = vmatpush1.msra.mxu0 %v2976_v2  ;;  %1837 = vmatpush3.msra.mxu1 %v2977_v3  ;;  %v2797_v2 = vld [vmem:[#allocation5 + $0x88] sm:$0xff] }
 0x441   :  { %985 = vmatprep.subr.mxu0 %v2978_v4  ;;  %1838 = vmatprep.subr.mxu1 %v2962_v0  ;;  %v2800_v3 = vld [vmem:[#allocation5 + $0x68] sm:$0xff]  ;;  %v2804_v4 = vld [vmem:[#allocation5 + $0x60] sm:$0xff] }
 0x442   :  { %986 = vmatpush1.msra.mxu0 %v2979_v5  ;;  %1019 = vmatprep.mubr.f32.mxu0 %v2962_v0  ;;  %v2807_v5 = vld [vmem:[#allocation5 + $0x70] sm:$0xff] }
 0x443   :  { %1839 = vmatpush3.msra.mxu1 %v2980_v6  ;;  %1840 = vmatprep.mubr.msk.f32.mxu1 %vm2124_vm0, %v2962_v0  ;;  %v2810_v6 = vld [vmem:[#allocation5 + $0x50] sm:$0xff] }
 0x444   :  { %1125 = vmatprep.subr.mxu0 %v2684_v7  ;;  %1843 = vmatprep.subr.mxu1 %v2962_v0 }
 0x4e3   :  { %v851_v9 = vpop.f32.mrf.mxu0  ;;  %v922_v10 = vpop.f32.mrf.mxu1 }
 0x4e4   :  { %v926_v11 = vadd.f32 %v851_v9, %v784_v8  ;;  %v943_v23 = vadd.f32 %v2392_v63, %v922_v10  ;;  %v2814_v8 = vld [vmem:[#allocation5 + $0x48] sm:$0xff]  ;;  %v2817_v9 = vld [vmem:[#allocation5 + $0x58] sm:$0xff] }
 0x4e5   :  { %v1807_v12 = vpop.f32.mrf.mxu1  ;;  %v853_v15 = vpop.f32.mrf.mxu0  ;;  %v2820_v10 = vld [vmem:[#allocation5 + $0x38] sm:$0xff] }
 0x4e6   :  { %v1489_v13 = vmul.f32 -1.442695, %v926_v11  ;;  %v936_v16 = vadd.f32 %v934_v14, %v853_v15  ;;  %v2824_v11 = vld [vmem:[#allocation5 + $0x30] sm:$0xff]  ;;  %v2827_v12 = vld [vmem:[#allocation5 + $0x40] sm:$0xff]  ;;  %v2834_v14 = vld [vmem:[#allocation5 + $0x18] sm:$0xff] }
 0x4e7   :  { %2981 = vst [vmem:[#allocation11_spill] sm:$0xff] %v2834_v14  ;;  %v2837_v15 = vld [vmem:[#allocation5 + $0x28] sm:$0xff] }
 0x4e8   :  { %1962 = vpow2.f32 %v1489_v13  ;;  %v1490_v17 = vmul.f32 -1.442695, %v936_v16  ;;  %v2830_v13 = vld [vmem:[#allocation5 + $0x20] sm:$0xff]  ;;  %2982 = vst [vmem:[#allocation12_spill] sm:$0xff] %v2837_v15  ;;  %v2840_v16 = vld [vmem:[#allocation5 + $0x8] sm:$0xff] }
 0x4e9   :  { %2983 = vst [vmem:[#allocation15_spill] sm:$0xff] %v2840_v16 }
 0x4ea   :  { %1964 = vpow2.f32 %v1490_v17  ;;  %v2844_v17 = vld [vmem:[#allocation5] sm:$0xff] }
 0x4eb   :  { %2984 = vst [vmem:[#allocation13_spill] sm:$0xff] %v2844_v17 }
 0x4f5   :  { %v1963_v18 = vpop.eup %1962 }
 0x4f6   :  { %v930_v19 = vadd.f32 1.0, %v1963_v18  ;;  %v2848_v18 = vld [vmem:[#allocation5 + $0x10] sm:$0xff] }
 0x4f7   :  { %v1965_v20 = vpop.eup %1964  ;;  %2985 = vst [vmem:[#allocation14_spill] sm:$0xff] %v2848_v18 }
 0x4f8   :  { %1966 = vrcp.f32 %v930_v19  ;;  %v940_v21 = vadd.f32 1.0, %v1965_v20  ;;  %v954_v19 = vld [vmem:[#allocation2 + $0x1e] sm:$0x3f] }
 0x4fa   :  { %1968 = vrcp.f32 %v940_v21 }
 0x505   :  { %v1967_v24 = vpop.eup %1966 }
 0x506   :  { %v944_v25 = vmul.f32 %v1967_v24, %v943_v23 }
 0x507   :  { %v1969_v27 = vpop.eup %1968 }
 0x508   :  { %v947_v26 = vadd.f32 %v945_v22, %v944_v25  ;;  %v949_v28 = vsub.f32 1.0, %v1969_v27  ;;  %v951_v31 = vmul.f32 %v1969_v27, %v2615_v53  ;;  %v2794_v53 = vld [vmem:[#allocation5 + $0x78] sm:$0xff]  ;;  %v1104_v25 = vrot.slane %v954_v19, 2 }
 0x50a   :  { %1970 = vtanh.f32 %v947_v26 }
 0x517   :  { %v1971_v29 = vpop.eup %1970 }
 0x518   :  { %v950_v30 = vmul.f32 %v1971_v29, %v949_v28 }
 0x51a   :  { %v2690_v32 = vadd.f32 %v951_v31, %v950_v30 }
 0x51c   :  { %1020 = vmatmul.mubr.f32.vlgmr.msra.gmra.mxu0 %v2690_v32  ;;  %1841 = vmatmul.mubr.f32.vlgmr.msra.gmra.mxu1 %v2690_v32 }
 0x51d   :  { %1126 = vmatpush1.msra.mxu0 %v2694_v33  ;;  %1844 = vmatpush3.msra.mxu1 %v2697_v34 }
 0x51e   :  { %1127 = vmatprep.subr.mxu0 %v2700_v35  ;;  %1845 = vmatprep.subr.mxu1 %v2962_v0 }
 0x51f   :  { %1128 = vmatpush1.msra.mxu0 %v2704_v36  ;;  %1846 = vmatpush3.msra.mxu1 %v2707_v37 }
 0x520   :  { %1129 = vmatprep.subr.mxu0 %v2710_v38  ;;  %1847 = vmatprep.subr.mxu1 %v2962_v0 }
 0x521   :  { %1130 = vmatpush1.msra.mxu0 %v2714_v39  ;;  %1848 = vmatpush3.msra.mxu1 %v2717_v42 }
 0x522   :  { %1131 = vmatprep.subr.mxu0 %v2720_v45  ;;  %1849 = vmatprep.subr.mxu1 %v2962_v0 }
 0x523   :  { %1132 = vmatpush1.msra.mxu0 %v2724_v46  ;;  %1850 = vmatpush3.msra.mxu1 %v2727_v47 }
 0x524   :  { %1133 = vmatprep.subr.mxu0 %v2730_v60  ;;  %1851 = vmatprep.subr.mxu1 %v2962_v0 }
 0x525   :  { %1134 = vmatpush1.msra.mxu0 %v2734_v54  ;;  %1852 = vmatpush3.msra.mxu1 %v2737_v40 }
 0x526   :  { %1135 = vmatprep.subr.mxu0 %v2740_v41  ;;  %1853 = vmatprep.subr.mxu1 %v2962_v0 }
 0x527   :  { %1136 = vmatpush1.msra.mxu0 %v2744_v43  ;;  %1854 = vmatpush3.msra.mxu1 %v2747_v48 }
 0x528   :  { %1137 = vmatprep.subr.mxu0 %v2750_v61  ;;  %1855 = vmatprep.subr.mxu1 %v2962_v0 }
 0x529   :  { %1138 = vmatpush1.msra.mxu0 %v2754_v57  ;;  %1856 = vmatpush3.msra.mxu1 %v2757_v44 }
 0x52a   :  { %1139 = vmatprep.subr.mxu0 %v2760_v55  ;;  %1857 = vmatprep.subr.mxu1 %v2962_v0 }
 0x52b   :  { %1140 = vmatpush1.msra.mxu0 %v2764_v56  ;;  %1858 = vmatpush3.msra.mxu1 %v2767_v58 }
 0x52c   :  { %1141 = vmatprep.subr.mxu0 %v2770_v59  ;;  %1859 = vmatprep.subr.mxu1 %v2962_v0 }
 0x52d   :  { %1142 = vmatpush1.msra.mxu0 %v2774_v49  ;;  %1860 = vmatpush3.msra.mxu1 %v2777_v1 }
 0x52e   :  { %1143 = vmatprep.subr.mxu0 %v2780_v50  ;;  %1861 = vmatprep.subr.mxu1 %v2962_v0 }
 0x52f   :  { %1144 = vmatpush1.msra.mxu0 %v2784_v62  ;;  %1862 = vmatpush3.msra.mxu1 %v2787_v51 }
 0x530   :  { %1145 = vmatprep.subr.mxu0 %v2790_v52  ;;  %1863 = vmatprep.subr.mxu1 %v2962_v0 }
 0x531   :  { %1146 = vmatpush1.msra.mxu0 %v2794_v53  ;;  %1864 = vmatpush3.msra.mxu1 %v2797_v2 }
 0x532   :  { %1147 = vmatprep.subr.mxu0 %v2800_v3  ;;  %1865 = vmatprep.subr.mxu1 %v2962_v0 }
 0x533   :  { %1148 = vmatpush1.msra.mxu0 %v2804_v4  ;;  %1866 = vmatpush3.msra.mxu1 %v2807_v5 }
 0x534   :  { %1149 = vmatprep.subr.mxu0 %v2810_v6  ;;  %1867 = vmatprep.subr.mxu1 %v2962_v0 }
 0x535   :  { %1150 = vmatpush1.msra.mxu0 %v2814_v8  ;;  %1868 = vmatpush3.msra.mxu1 %v2817_v9 }
 0x536   :  { %1151 = vmatprep.subr.mxu0 %v2820_v10  ;;  %1869 = vmatprep.subr.mxu1 %v2962_v0 }
 0x537   :  { %1152 = vmatpush1.msra.mxu0 %v2824_v11  ;;  %1870 = vmatpush3.msra.mxu1 %v2827_v12 }
 0x538   :  { %1153 = vmatprep.subr.mxu0 %v2830_v13  ;;  %1871 = vmatprep.subr.mxu1 %v2962_v0 }
 0x539   :  { %1154 = vmatpush1.msra.mxu0 %v2834_v14  ;;  %1872 = vmatpush3.msra.mxu1 %v2837_v15 }
 0x53a   :  { %1155 = vmatprep.subr.mxu0 %v2840_v16  ;;  %1873 = vmatprep.subr.mxu1 %v2962_v0 }
 0x53b   :  { %1156 = vmatpush1.msra.mxu0 %v2844_v17  ;;  %1189 = vmatprep.mubr.f32.mxu0 %v2962_v0 }
 0x53c   :  { %1874 = vmatpush3.msra.mxu1 %v2848_v18  ;;  %1875 = vmatprep.mubr.msk.f32.mxu1 %vm2124_vm0, %v2962_v0 }
 0x53d   :  { %1295 = vmatprep.subr.mxu0 %v2684_v7  ;;  %1878 = vmatprep.subr.mxu1 %v2962_v0  ;;  %v1115_v7 = vrot.slane %v954_v19, 4 }
 0x5dc   :  { %v1021_v20 = vpop.f32.mrf.mxu0  ;;  %v1092_v21 = vpop.f32.mrf.mxu1 }
 0x5dd   :  { %v1096_v22 = vadd.f32 %v1021_v20, %v954_v19  ;;  %v1113_v17 = vadd.f32 %v2392_v63, %v1092_v21  ;;  %v2986_v63 = vld [vmem:[#allocation11_spill] sm:$0xff] }
 0x5de   :  { %v1842_v23 = vpop.f32.mrf.mxu1  ;;  %v1023_v26 = vpop.f32.mrf.mxu0 }
 0x5df   :  { %v1491_v24 = vmul.f32 -1.442695, %v1096_v22  ;;  %v1106_v27 = vadd.f32 %v1104_v25, %v1023_v26 }
 0x5e1   :  { %1972 = vpow2.f32 %v1491_v24  ;;  %v1492_v28 = vmul.f32 -1.442695, %v1106_v27 }
 0x5e3   :  { %1974 = vpow2.f32 %v1492_v28 }
 0x5ee   :  { %v1973_v29 = vpop.eup %1972 }
 0x5ef   :  { %v1100_v30 = vadd.f32 1.0, %v1973_v29 }
 0x5f0   :  { %v1975_v31 = vpop.eup %1974 }
 0x5f1   :  { %1976 = vrcp.f32 %v1100_v30  ;;  %v1110_v18 = vadd.f32 1.0, %v1975_v31 }
 0x5f3   :  { %1978 = vrcp.f32 %v1110_v18 }
 0x5fe   :  { %v1977_v16 = vpop.eup %1976 }
 0x5ff   :  { %v1114_v15 = vmul.f32 %v1977_v16, %v1113_v17 }
 0x600   :  { %v1979_v22 = vpop.eup %1978 }
 0x601   :  { %v1117_v20 = vadd.f32 %v1115_v7, %v1114_v15  ;;  %v1119_v23 = vsub.f32 1.0, %v1979_v22  ;;  %v1121_v25 = vmul.f32 %v1979_v22, %v2690_v32  ;;  %v2987_v32 = vld [vmem:[#allocation12_spill] sm:$0xff] }
 0x603   :  { %1980 = vtanh.f32 %v1117_v20 }
 0x610   :  { %v1981_v14 = vpop.eup %1980 }
 0x611   :  { %v1120_v24 = vmul.f32 %v1981_v14, %v1119_v23 }
 0x613   :  { %v2857_v26 = vadd.f32 %v1121_v25, %v1120_v24 }
 0x615   :  { %1190 = vmatmul.mubr.f32.vlgmr.msra.gmra.mxu0 %v2857_v26  ;;  %1876 = vmatmul.mubr.f32.vlgmr.msra.gmra.mxu1 %v2857_v26 }
 0x616   :  { %1296 = vmatpush1.msra.mxu0 %v2694_v33  ;;  %1879 = vmatpush3.msra.mxu1 %v2697_v34  ;;  %v2988_v33 = vld [vmem:[#allocation15_spill] sm:$0xff]  ;;  %v2989_v34 = vld [vmem:[#allocation13_spill] sm:$0xff] }
 0x617   :  { %1297 = vmatprep.subr.mxu0 %v2700_v35  ;;  %1880 = vmatprep.subr.mxu1 %v2962_v0  ;;  %v2990_v35 = vld [vmem:[#allocation14_spill] sm:$0xff] }
 0x618   :  { %1298 = vmatpush1.msra.mxu0 %v2704_v36  ;;  %1881 = vmatpush3.msra.mxu1 %v2707_v37  ;;  %v1124_v36 = vld [vmem:[#allocation2 + $0x24] sm:$0x3f] }
 0x619   :  { %1299 = vmatprep.subr.mxu0 %v2710_v38  ;;  %1882 = vmatprep.subr.mxu1 %v2962_v0 }
 0x61a   :  { %1300 = vmatpush1.msra.mxu0 %v2714_v39  ;;  %1883 = vmatpush3.msra.mxu1 %v2717_v42 }
 0x61b   :  { %1301 = vmatprep.subr.mxu0 %v2720_v45  ;;  %1884 = vmatprep.subr.mxu1 %v2962_v0 }
 0x61c   :  { %1302 = vmatpush1.msra.mxu0 %v2724_v46  ;;  %1885 = vmatpush3.msra.mxu1 %v2727_v47  ;;  %v1274_v46 = vrot.slane %v1124_v36, 2 }
 0x61d   :  { %1303 = vmatprep.subr.mxu0 %v2730_v60  ;;  %1886 = vmatprep.subr.mxu1 %v2962_v0 }
 0x61e   :  { %1304 = vmatpush1.msra.mxu0 %v2734_v54  ;;  %1887 = vmatpush3.msra.mxu1 %v2737_v40 }
 0x61f   :  { %1305 = vmatprep.subr.mxu0 %v2740_v41  ;;  %1888 = vmatprep.subr.mxu1 %v2962_v0 }
 0x620   :  { %1306 = vmatpush1.msra.mxu0 %v2744_v43  ;;  %1889 = vmatpush3.msra.mxu1 %v2747_v48 }
 0x621   :  { %1307 = vmatprep.subr.mxu0 %v2750_v61  ;;  %1890 = vmatprep.subr.mxu1 %v2962_v0  ;;  %v1285_v61 = vrot.slane %v1124_v36, 4 }
 0x622   :  { %1308 = vmatpush1.msra.mxu0 %v2754_v57  ;;  %1891 = vmatpush3.msra.mxu1 %v2757_v44 }
 0x623   :  { %1309 = vmatprep.subr.mxu0 %v2760_v55  ;;  %1892 = vmatprep.subr.mxu1 %v2962_v0 }
 0x624   :  { %1310 = vmatpush1.msra.mxu0 %v2764_v56  ;;  %1893 = vmatpush3.msra.mxu1 %v2767_v58 }
 0x625   :  { %1311 = vmatprep.subr.mxu0 %v2770_v59  ;;  %1894 = vmatprep.subr.mxu1 %v2962_v0 }
 0x626   :  { %1312 = vmatpush1.msra.mxu0 %v2774_v49  ;;  %1895 = vmatpush3.msra.mxu1 %v2777_v1 }
 0x627   :  { %1313 = vmatprep.subr.mxu0 %v2780_v50  ;;  %1896 = vmatprep.subr.mxu1 %v2962_v0 }
 0x628   :  { %1314 = vmatpush1.msra.mxu0 %v2784_v62  ;;  %1897 = vmatpush3.msra.mxu1 %v2787_v51  ;;  %v1294_v51 = vld [vmem:[#allocation2 + $0x2a] sm:$0x3f] }
 0x629   :  { %1315 = vmatprep.subr.mxu0 %v2790_v52  ;;  %1898 = vmatprep.subr.mxu1 %v2962_v0  ;;  %v1455_v14 = vrot.slane %v1294_v51, 4 }
 0x62a   :  { %1316 = vmatpush1.msra.mxu0 %v2794_v53  ;;  %1899 = vmatpush3.msra.mxu1 %v2797_v2 }
 0x62b   :  { %1317 = vmatprep.subr.mxu0 %v2800_v3  ;;  %1900 = vmatprep.subr.mxu1 %v2962_v0 }
 0x62c   :  { %1318 = vmatpush1.msra.mxu0 %v2804_v4  ;;  %1901 = vmatpush3.msra.mxu1 %v2807_v5  ;;  %v1444_v5 = vrot.slane %v1294_v51, 2 }
 0x62d   :  { %1319 = vmatprep.subr.mxu0 %v2810_v6  ;;  %1902 = vmatprep.subr.mxu1 %v2962_v0 }
 0x62e   :  { %1320 = vmatpush1.msra.mxu0 %v2814_v8  ;;  %1903 = vmatpush3.msra.mxu1 %v2817_v9 }
 0x62f   :  { %1321 = vmatprep.subr.mxu0 %v2820_v10  ;;  %1904 = vmatprep.subr.mxu1 %v2962_v0 }
 0x630   :  { %1322 = vmatpush1.msra.mxu0 %v2824_v11  ;;  %1905 = vmatpush3.msra.mxu1 %v2827_v12 }
 0x631   :  { %1323 = vmatprep.subr.mxu0 %v2830_v13  ;;  %1906 = vmatprep.subr.mxu1 %v2962_v0 }
 0x632   :  { %1324 = vmatpush1.msra.mxu0 %v2986_v63  ;;  %1907 = vmatpush3.msra.mxu1 %v2987_v32 }
 0x633   :  { %1325 = vmatprep.subr.mxu0 %v2988_v33  ;;  %1908 = vmatprep.subr.mxu1 %v2962_v0 }
 0x634   :  { %1326 = vmatpush1.msra.mxu0 %v2989_v34  ;;  %1359 = vmatprep.mubr.f32.mxu0 %v2962_v0 }
 0x635   :  { %1909 = vmatpush3.msra.mxu1 %v2990_v35  ;;  %1910 = vmatprep.mubr.msk.f32.mxu1 %vm2124_vm0, %v2962_v0  ;;  %v2050_v0 = vld [vmem:[%s2935_s2] ss:$0 sm:$0xff]  ;;  %s2125_s2 = smov [#allocation7]  }
 0x636   :  { %s1470_s28 = sshll.u32 %s2125_s2, 4  ;;  %s1471_s28 = int_to_ptr.vmem [resolvable:$true] %s1470_s28 }
 0x637   :  { %s2091_s29 = scalar_lea.vmem %s1471_s28, 32  ;;  %p2096_p11 = scmp.lt.s32.totalorder %s1471_s28, %s1471_s28 }
 0x638   :  { %p2092_p10 = scmp.ne.s32.totalorder %s1471_s28, %s2091_s29  ;;  %p2097_p12 = scmp.lt.s32.totalorder %s2091_s29, %s2091_s29 }
 0x63a   :  { %p2098_p13 = por %p2097_p12, %p2096_p11 }
 0x63c   :  { %p2099_p0 = pnand %p2098_p13, %p2092_p10 }
 0x6d5   :  { %v1191_v37 = vpop.f32.mrf.mxu0  ;;  %v1262_v38 = vpop.f32.mrf.mxu1 }
 0x6d6   :  { %v1266_v39 = vadd.f32 %v1191_v37, %v1124_v36  ;;  %v1283_v57 = vadd.f32 %v2050_v0, %v1262_v38 }
 0x6d7   :  { %v1877_v42 = vpop.f32.mrf.mxu1  ;;  %v1193_v47 = vpop.f32.mrf.mxu0 }
 0x6d8   :  { %v1493_v45 = vmul.f32 -1.442695, %v1266_v39  ;;  %v1276_v60 = vadd.f32 %v1274_v46, %v1193_v47 }
 0x6da   :  { %1982 = vpow2.f32 %v1493_v45  ;;  %v1494_v54 = vmul.f32 -1.442695, %v1276_v60 }
 0x6dc   :  { %1984 = vpow2.f32 %v1494_v54 }
 0x6e7   :  { %v1983_v40 = vpop.eup %1982 }
 0x6e8   :  { %v1270_v41 = vadd.f32 1.0, %v1983_v40 }
 0x6e9   :  { %v1985_v43 = vpop.eup %1984 }
 0x6ea   :  { %1986 = vrcp.f32 %v1270_v41  ;;  %v1280_v48 = vadd.f32 1.0, %v1985_v43 }
 0x6ec   :  { %1988 = vrcp.f32 %v1280_v48 }
 0x6f7   :  { %v1987_v44 = vpop.eup %1986 }
 0x6f8   :  { %v1284_v55 = vmul.f32 %v1987_v44, %v1283_v57 }
 0x6f9   :  { %v1989_v58 = vpop.eup %1988 }
 0x6fa   :  { %v1287_v56 = vadd.f32 %v1285_v61, %v1284_v55  ;;  %v1289_v59 = vsub.f32 1.0, %v1989_v58  ;;  %v1291_v50 = vmul.f32 %v1989_v58, %v2857_v26 }
 0x6fc   :  { %1990 = vtanh.f32 %v1287_v56 }
 0x709   :  { %v1991_v49 = vpop.eup %1990 }
 0x70a   :  { %v1290_v1 = vmul.f32 %v1991_v49, %v1289_v59 }
 0x70c   :  { %v1292_v62 = vadd.f32 %v1291_v50, %v1290_v1 }
 0x70e   :  { %1360 = vmatmul.mubr.f32.vlgmr.msra.gmra.mxu0 %v1292_v62  ;;  %1911 = vmatmul.mubr.f32.vlgmr.msra.gmra.mxu1 %v1292_v62 }
 0x7ce   :  { %v1361_v52 = vpop.f32.mrf.mxu0  ;;  %v1432_v53 = vpop.f32.mrf.mxu1 }
 0x7cf   :  { %v1436_v2 = vadd.f32 %v1361_v52, %v1294_v51  ;;  %v1453_v15 = vadd.f32 %v2050_v0, %v1432_v53 }
 0x7d0   :  { %v1912_v3 = vpop.f32.mrf.mxu1  ;;  %v1363_v6 = vpop.f32.mrf.mxu0 }
 0x7d1   :  { %v1495_v4 = vmul.f32 -1.442695, %v1436_v2  ;;  %v1446_v8 = vadd.f32 %v1444_v5, %v1363_v6 }
 0x7d3   :  { %1992 = vpow2.f32 %v1495_v4  ;;  %v1496_v9 = vmul.f32 -1.442695, %v1446_v8 }
 0x7d5   :  { %1994 = vpow2.f32 %v1496_v9 }
 0x7e0   :  { %v1993_v10 = vpop.eup %1992 }
 0x7e1   :  { %v1440_v11 = vadd.f32 1.0, %v1993_v10 }
 0x7e2   :  { %v1995_v12 = vpop.eup %1994 }
 0x7e3   :  { %1996 = vrcp.f32 %v1440_v11  ;;  %v1450_v13 = vadd.f32 1.0, %v1995_v12 }
 0x7e5   :  { %1998 = vrcp.f32 %v1450_v13 }
 0x7f0   :  { %v1997_v16 = vpop.eup %1996 }
 0x7f1   :  { %v1454_v17 = vmul.f32 %v1997_v16, %v1453_v15 }
 0x7f2   :  { %v1999_v19 = vpop.eup %1998 }
 0x7f3   :  { %v1457_v18 = vadd.f32 %v1455_v14, %v1454_v17  ;;  %v1459_v21 = vsub.f32 1.0, %v1999_v19  ;;  %v1461_v29 = vmul.f32 %v1999_v19, %v1292_v62 }
 0x7f5   :  { %2000 = vtanh.f32 %v1457_v18 }
 0x802   :  { %v2001_v27 = vpop.eup %2000 }
 0x803   :  { %v1460_v28 = vmul.f32 %v2001_v27, %v1459_v21 }
 0x805   :  { %v1462_v30 = vadd.f32 %v1461_v29, %v1460_v28 }
 0x807   :  { %1463 = vst [vmem:[#allocation7] sm:$0x3] %v1462_v30 }
 0x808   :  { %2102 = shalt.err (!%p2099_p0)
}
 0x809   :  { %1473 = dma.vmem_to_hbm [thread:$0]  %s1471_s28, 32, %s2936_s3, [#allocation4]  }
 0x80a   :  { %2115 = dma.done.wait [#allocation4], 32  }
 0x80b   :  { %2116 = vsyncadd [#allocation4], 4294967264 }
 0x80c   :  { %1477 = vsyncpa [#allocation3], 1 }
 0x80d   :  { %1478 = vsyncpa [#allocation6], 1 }
 0x80e   :  { %1479 = vsyncpa [#allocation4], 1 }

</bundles_post_ra>
